<compile_context>
chip_gen: v5e
topology: v5e:2x2
jax: 0.10.0
libtpu: 0.0.40
codegen_flags: <defaults>
</compile_context>

<pallas_src>
import math

import jax
import jax.numpy as jnp
from jax.experimental import pallas as pl
from jax.experimental.pallas import tpu as pltpu


_PARAM_ORDER = ("wq", "bq", "wk", "bk", "wv", "bv", "wo", "bo",
                "g1", "be1", "w1", "b1", "w2", "b2", "g2", "be2")


def _layernorm(x, gamma, beta, eps):
    # Two-pass variance (closer to PyTorch LayerNorm than E[x^2] - mean^2).
    mu = jnp.mean(x, axis=-1, keepdims=True)
    xc = x - mu
    var = jnp.mean(xc * xc, axis=-1, keepdims=True)
    return xc * jax.lax.rsqrt(var + eps) * gamma + beta


# ----------------------------------------------------------------------------
# Fused encoder-layer kernel: one grid step == TB batch elements.
# ----------------------------------------------------------------------------
def make_encoder_layer_kernel(*, nhead, d_model, seq, tb, has_pos,
                              has_final_norm, compute_dtype, eps=1e-5):
    dh = d_model // nhead
    scale = 1.0 / math.sqrt(dh)
    cdt = compute_dtype
    n_params = 16 + (2 if has_final_norm else 0)
    m_rows = tb * seq

    def kernel(*refs):
        idx = 0
        x_ref = refs[idx]; idx += 1
        if has_pos:
            pos_ref = refs[idx]; idx += 1
        params = refs[idx:idx + n_params]
        out_ref = refs[-1]
        (wq, bq, wk, bk, wv, bv, wo, bo,
         g1, be1, w1, b1, w2, b2, g2, be2) = params[:16]

        # (TB, S, D) -> (TB*S, D): fatter MXU M for projections / FFN.
        x = x_ref[...].reshape(m_rows, d_model)                 # compute dtype
        x32 = x.astype(jnp.float32)                             # residual path
        if has_pos:
            qk_in = (x32 + pos_ref[...].reshape(m_rows, d_model)
                     .astype(jnp.float32)).astype(cdt)          # add in f32
        else:
            qk_in = x

        # --- QKV projections (pre-transposed weights, f32 accumulate) ---
        q = (jnp.dot(qk_in, wq[...], preferred_element_type=jnp.float32)
             + bq[...]).astype(cdt)
        k = (jnp.dot(qk_in, wk[...], preferred_element_type=jnp.float32)
             + bk[...]).astype(cdt)
        v = (jnp.dot(x, wv[...], preferred_element_type=jnp.float32)
             + bv[...]).astype(cdt)

        # --- multi-head self-attention ---
        # Per-batch-element static loop; per-head out-projection partial
        # products accumulated (no lane-dim concat of heads).
        # TODO(synk): batch heads into one dot_general + flash-style q/kv
        # tiling for long sequences; full attention fits VMEM at demo sizes.
        # TODO(synk): src_mask / src_key_padding_mask would be an additive
        # -inf bias on `s` (the demo path passes None).
        parts = []
        for b in range(tb):
            r0 = b * seq
            acc = None
            for h in range(nhead):
                c0 = h * dh
                qh = q[r0:r0 + seq, c0:c0 + dh]
                kh = k[r0:r0 + seq, c0:c0 + dh]
                vh = v[r0:r0 + seq, c0:c0 + dh]
                # q @ k^T without materializing a transpose.
                s = jax.lax.dot_general(
                    qh, kh, (((1,), (1,)), ((), ())),
                    preferred_element_type=jnp.float32) * scale
                m = jnp.max(s, axis=-1, keepdims=True)
                p = jnp.exp(s - m)
                l = jnp.sum(p, axis=-1, keepdims=True)
                ctx = jnp.dot(p.astype(cdt), vh,
                              preferred_element_type=jnp.float32)
                # Deferred softmax normalization (S*dh divides, EUP reciprocal).
                ctx = ctx * pl.reciprocal(l, approx=True)
                part = jnp.dot(ctx.astype(cdt), wo[c0:c0 + dh, :],
                               preferred_element_type=jnp.float32)
                acc = part if acc is None else acc + part
            parts.append(acc)
        attn = parts[0] if tb == 1 else jnp.concatenate(parts, axis=0)
        attn = attn + bo[...]

        # --- residual + LayerNorm1 (f32) ---
        h1 = _layernorm(x32 + attn, g1[...], be1[...], eps)

        # --- FFN: Linear -> ReLU -> Linear ---
        f = jnp.dot(h1.astype(cdt), w1[...],
                    preferred_element_type=jnp.float32) + b1[...]
        f = jnp.maximum(f, 0.0)
        f = jnp.dot(f.astype(cdt), w2[...],
                    preferred_element_type=jnp.float32) + b2[...]

        # --- residual + LayerNorm2 ---
        out = _layernorm(h1 + f, g2[...], be2[...], eps)

        # Optional TransformerEncoder final norm, folded into the last layer.
        if has_final_norm:
            gn, bn = params[16], params[17]
            out = _layernorm(out, gn[...], bn[...], eps)

        # TODO(synk): for d_model < 128 this store is a masked partial store;
        # pad d_model (or fold more rows) if it ever shows in profiles.
        out_ref[...] = out.reshape(tb, seq, d_model).astype(out_ref.dtype)

    return kernel


def encoder_layer_pallas(x, pos, params, *, nhead, tb=None,
                         final_norm_params=None, out_dtype=None,
                         compute_dtype=jnp.bfloat16):
    """x, pos: (B, S, D) in compute_dtype.  Returns (B, S, D) out_dtype."""
    B, S, D = x.shape
    has_pos = pos is not None
    has_final_norm = final_norm_params is not None
    out_dtype = compute_dtype if out_dtype is None else out_dtype

    if tb is None:
        # Fold batch elements per grid step to fatten the matmul M dimension
        # while keeping per-step VMEM bounded.
        tb = 1
        for cand in range(1, B + 1):
            if B % cand == 0 and cand * S <= 256:
                tb = cand
    assert B % tb == 0

    kernel = make_encoder_layer_kernel(
        nhead=nhead, d_model=D, seq=S, tb=tb, has_pos=has_pos,
        has_final_norm=has_final_norm, compute_dtype=compute_dtype)

    ordered = [params[k] for k in _PARAM_ORDER]
    if has_final_norm:
        ordered += list(final_norm_params)

    def const_spec(a):
        # Whole array, same block every grid step -> stays resident in VMEM.
        return pl.BlockSpec(a.shape, lambda b, n=a.ndim: (0,) * n)

    x_spec = pl.BlockSpec((tb, S, D), lambda b: (b, 0, 0))
    in_specs = [x_spec] + ([x_spec] if has_pos else []) \
        + [const_spec(a) for a in ordered]
    inputs = [x] + ([pos] if has_pos else []) + ordered

    return pl.pallas_call(
        kernel,
        out_shape=jax.ShapeDtypeStruct((B, S, D), out_dtype),
        grid=(B // tb,),
        in_specs=in_specs,
        out_specs=pl.BlockSpec((tb, S, D), lambda b: (b, 0, 0)),
        compiler_params=pltpu.CompilerParams(
            dimension_semantics=("parallel",),
            vmem_limit_bytes=32 * 1024 * 1024),
    )(*inputs)


# ----------------------------------------------------------------------------
# TransformerEncoder.forward
# ----------------------------------------------------------------------------
def transformer_encoder_forward(src, layer_params_list, *, nhead,
                                norm_params=None, mask=None,
                                src_key_padding_mask=None, pos=None,
                                compute_dtype=jnp.bfloat16):
    """src/pos: (S, B, D) like PyTorch (seq, batch, d_model).  Returns (S, B, D) f32."""
    if mask is not None or src_key_padding_mask is not None:
        # TODO(synk): attention masking not implemented (mask=None eval path).
        raise NotImplementedError("attention masks not supported")

    S, B, D = src.shape
    x = jnp.transpose(src, (1, 0, 2)).astype(compute_dtype)          # (B, S, D)
    p = None if pos is None else \
        jnp.transpose(pos, (1, 0, 2)).astype(compute_dtype)

    # TODO(synk): single pallas_call for the whole stack (layer grid axis +
    # activation carried in VMEM scratch) would remove the per-layer bf16
    # (B,S,D) HBM round trips; kept per-layer for simplicity here.
    n = len(layer_params_list)
    for i, lp in enumerate(layer_params_list):
        last = (i == n - 1)
        x = encoder_layer_pallas(
            x, p, lp, nhead=nhead,
            final_norm_params=norm_params if last else None,
            out_dtype=jnp.float32 if last else compute_dtype,
            compute_dtype=compute_dtype)
    return jnp.transpose(x, (1, 0, 2))                                # (S, B, D)


# ----------------------------------------------------------------------------
# Parameter init (PyTorch-Linear-style uniform; weights stored PRE-TRANSPOSED
# as (C_in, C_out) in bf16 so the kernel never transposes).
# ----------------------------------------------------------------------------
def init_transformer_params(key, num_layers, d_model, nhead, dim_ff,
                            with_final_norm=True, compute_dtype=jnp.bfloat16):
    def linear(k, fan_in, fan_out):
        kw, kb = jax.random.split(k)
        bound = 1.0 / math.sqrt(fan_in)
        w = jax.random.uniform(kw, (fan_in, fan_out), jnp.float32, -bound, bound)
        b = jax.random.uniform(kb, (1, fan_out), jnp.float32, -bound, bound)
        return w.astype(compute_dtype), b

    layers = []
    for _ in range(num_layers):
        keys = jax.random.split(key, 7)
        key = keys[0]
        wq, bq = linear(keys[1], d_model, d_model)
        wk, bk = linear(keys[2], d_model, d_model)
        wv, bv = linear(keys[3], d_model, d_model)
        wo, bo = linear(keys[4], d_model, d_model)
        w1, b1 = linear(keys[5], d_model, dim_ff)
        w2, b2 = linear(keys[6], dim_ff, d_model)
        layers.append(dict(
            wq=wq, bq=bq, wk=wk, bk=bk, wv=wv, bv=bv, wo=wo, bo=bo,
            g1=jnp.ones((1, d_model), jnp.float32),
            be1=jnp.zeros((1, d_model), jnp.float32),
            w1=w1, b1=b1, w2=w2, b2=b2,
            g2=jnp.ones((1, d_model), jnp.float32),
            be2=jnp.zeros((1, d_model), jnp.float32)))
    norm = None
    if with_final_norm:
        norm = (jnp.ones((1, d_model), jnp.float32),
                jnp.zeros((1, d_model), jnp.float32))
    return layers, norm


if __name__ == "__main__":
    key = jax.random.PRNGKey(0)
    k_src, k_pos, k_par = jax.random.split(key, 3)

    # Small shapes consistent with the module: (seq, batch, d_model).
    S, B, D = 16, 2, 32
    nhead, dim_ff, num_layers = 4, 64, 2

    src = jax.random.normal(k_src, (S, B, D), jnp.float32)
    pos = 0.1 * jax.random.normal(k_pos, (S, B, D), jnp.float32)

    layer_params, norm_params = init_transformer_params(
        k_par, num_layers, D, nhead, dim_ff, with_final_norm=True)

    out = transformer_encoder_forward(
        src, layer_params, nhead=nhead, norm_params=norm_params,
        mask=None, src_key_padding_mask=None, pos=pos)

    out = jax.block_until_ready(out)
    assert out.shape == (S, B, D)
    assert bool(jnp.all(jnp.isfinite(out)))
    print("KERNEL_OK")
</pallas_src>

<mosaic_0001>
module attributes {stable_mosaic.version = 11 : i64} {
  func.func @kernel(%arg0: i32, %arg1: memref<2x16x32xbf16, #tpu.memory_space<vmem>>, %arg2: memref<2x16x32xbf16, #tpu.memory_space<vmem>>, %arg3: memref<32x32xbf16, #tpu.memory_space<vmem>>, %arg4: memref<1x32xf32, #tpu.memory_space<vmem>>, %arg5: memref<32x32xbf16, #tpu.memory_space<vmem>>, %arg6: memref<1x32xf32, #tpu.memory_space<vmem>>, %arg7: memref<32x32xbf16, #tpu.memory_space<vmem>>, %arg8: memref<1x32xf32, #tpu.memory_space<vmem>>, %arg9: memref<32x32xbf16, #tpu.memory_space<vmem>>, %arg10: memref<1x32xf32, #tpu.memory_space<vmem>>, %arg11: memref<1x32xf32, #tpu.memory_space<vmem>>, %arg12: memref<1x32xf32, #tpu.memory_space<vmem>>, %arg13: memref<32x64xbf16, #tpu.memory_space<vmem>>, %arg14: memref<1x64xf32, #tpu.memory_space<vmem>>, %arg15: memref<64x32xbf16, #tpu.memory_space<vmem>>, %arg16: memref<1x32xf32, #tpu.memory_space<vmem>>, %arg17: memref<1x32xf32, #tpu.memory_space<vmem>>, %arg18: memref<1x32xf32, #tpu.memory_space<vmem>>, %arg19: memref<2x16x32xbf16, #tpu.memory_space<vmem>>) attributes {dimension_semantics = [#tpu.dimension_semantics<parallel>], iteration_bounds = array<i64: 1>, scalar_prefetch = 0 : i64, scratch_operands = 0 : i64, tpu.core_type = #tpu.core_type<tc>, window_params = [{transform_indices = @transform_0, window_bounds = array<i64: 2, 16, 32>}, {transform_indices = @transform_1, window_bounds = array<i64: 2, 16, 32>}, {pipeline_mode = #tpu.pipeline_mode<synchronous>, transform_indices = @transform_2, window_bounds = array<i64: 32, 32>}, {pipeline_mode = #tpu.pipeline_mode<synchronous>, transform_indices = @transform_3, window_bounds = array<i64: 1, 32>}, {pipeline_mode = #tpu.pipeline_mode<synchronous>, transform_indices = @transform_4, window_bounds = array<i64: 32, 32>}, {pipeline_mode = #tpu.pipeline_mode<synchronous>, transform_indices = @transform_5, window_bounds = array<i64: 1, 32>}, {pipeline_mode = #tpu.pipeline_mode<synchronous>, transform_indices = @transform_6, window_bounds = array<i64: 32, 32>}, {pipeline_mode = #tpu.pipeline_mode<synchronous>, transform_indices = @transform_7, window_bounds = array<i64: 1, 32>}, {pipeline_mode = #tpu.pipeline_mode<synchronous>, transform_indices = @transform_8, window_bounds = array<i64: 32, 32>}, {pipeline_mode = #tpu.pipeline_mode<synchronous>, transform_indices = @transform_9, window_bounds = array<i64: 1, 32>}, {pipeline_mode = #tpu.pipeline_mode<synchronous>, transform_indices = @transform_10, window_bounds = array<i64: 1, 32>}, {pipeline_mode = #tpu.pipeline_mode<synchronous>, transform_indices = @transform_11, window_bounds = array<i64: 1, 32>}, {pipeline_mode = #tpu.pipeline_mode<synchronous>, transform_indices = @transform_12, window_bounds = array<i64: 32, 64>}, {pipeline_mode = #tpu.pipeline_mode<synchronous>, transform_indices = @transform_13, window_bounds = array<i64: 1, 64>}, {pipeline_mode = #tpu.pipeline_mode<synchronous>, transform_indices = @transform_14, window_bounds = array<i64: 64, 32>}, {pipeline_mode = #tpu.pipeline_mode<synchronous>, transform_indices = @transform_15, window_bounds = array<i64: 1, 32>}, {pipeline_mode = #tpu.pipeline_mode<synchronous>, transform_indices = @transform_16, window_bounds = array<i64: 1, 32>}, {pipeline_mode = #tpu.pipeline_mode<synchronous>, transform_indices = @transform_17, window_bounds = array<i64: 1, 32>}, {transform_indices = @transform_18, window_bounds = array<i64: 2, 16, 32>}]} {
    %c0 = arith.constant 0 : index
    %c0_0 = arith.constant 0 : index
    %c0_1 = arith.constant 0 : index
    %0 = vector.load %arg1[%c0, %c0_0, %c0_1] : memref<2x16x32xbf16, #tpu.memory_space<vmem>>, vector<2x16x32xbf16>
    %1 = vector.shape_cast %0 : vector<2x16x32xbf16> to vector<32x32xbf16>
    %2 = arith.extf %1 : vector<32x32xbf16> to vector<32x32xf32>
    %c0_2 = arith.constant 0 : index
    %c0_3 = arith.constant 0 : index
    %c0_4 = arith.constant 0 : index
    %3 = vector.load %arg2[%c0_2, %c0_3, %c0_4] : memref<2x16x32xbf16, #tpu.memory_space<vmem>>, vector<2x16x32xbf16>
    %4 = vector.shape_cast %3 : vector<2x16x32xbf16> to vector<32x32xbf16>
    %5 = arith.extf %4 : vector<32x32xbf16> to vector<32x32xf32>
    %6 = arith.addf %2, %5 : vector<32x32xf32>
    %7 = arith.truncf %6 : vector<32x32xf32> to vector<32x32xbf16>
    %c0_5 = arith.constant 0 : index
    %c0_6 = arith.constant 0 : index
    %8 = vector.load %arg3[%c0_5, %c0_6] : memref<32x32xbf16, #tpu.memory_space<vmem>>, vector<32x32xbf16>
    %cst = arith.constant dense<0.000000e+00> : vector<32x32xf32>
    %9 = tpu.matmul %7, %8, %cst {dimension_numbers = #tpu.dot_dimension_numbers<[1], [0], [0], [1], [0, 0, 1, 1], [], []>} : vector<32x32xbf16>, vector<32x32xbf16>, vector<32x32xf32> -> vector<32x32xf32>
    %c0_7 = arith.constant 0 : index
    %c0_8 = arith.constant 0 : index
    %10 = vector.load %arg4[%c0_7, %c0_8] : memref<1x32xf32, #tpu.memory_space<vmem>>, vector<1x32xf32>
    %11 = vector.broadcast %10 : vector<1x32xf32> to vector<32x32xf32>
    %12 = arith.addf %9, %11 : vector<32x32xf32>
    %13 = arith.truncf %12 : vector<32x32xf32> to vector<32x32xbf16>
    %c0_9 = arith.constant 0 : index
    %c0_10 = arith.constant 0 : index
    %14 = vector.load %arg5[%c0_9, %c0_10] : memref<32x32xbf16, #tpu.memory_space<vmem>>, vector<32x32xbf16>
    %cst_11 = arith.constant dense<0.000000e+00> : vector<32x32xf32>
    %15 = tpu.matmul %7, %14, %cst_11 {dimension_numbers = #tpu.dot_dimension_numbers<[1], [0], [0], [1], [0, 0, 1, 1], [], []>} : vector<32x32xbf16>, vector<32x32xbf16>, vector<32x32xf32> -> vector<32x32xf32>
    %c0_12 = arith.constant 0 : index
    %c0_13 = arith.constant 0 : index
    %16 = vector.load %arg6[%c0_12, %c0_13] : memref<1x32xf32, #tpu.memory_space<vmem>>, vector<1x32xf32>
    %17 = vector.broadcast %16 : vector<1x32xf32> to vector<32x32xf32>
    %18 = arith.addf %15, %17 : vector<32x32xf32>
    %19 = arith.truncf %18 : vector<32x32xf32> to vector<32x32xbf16>
    %c0_14 = arith.constant 0 : index
    %c0_15 = arith.constant 0 : index
    %20 = vector.load %arg7[%c0_14, %c0_15] : memref<32x32xbf16, #tpu.memory_space<vmem>>, vector<32x32xbf16>
    %cst_16 = arith.constant dense<0.000000e+00> : vector<32x32xf32>
    %21 = tpu.matmul %1, %20, %cst_16 {dimension_numbers = #tpu.dot_dimension_numbers<[1], [0], [0], [1], [0, 0, 1, 1], [], []>} : vector<32x32xbf16>, vector<32x32xbf16>, vector<32x32xf32> -> vector<32x32xf32>
    %c0_17 = arith.constant 0 : index
    %c0_18 = arith.constant 0 : index
    %22 = vector.load %arg8[%c0_17, %c0_18] : memref<1x32xf32, #tpu.memory_space<vmem>>, vector<1x32xf32>
    %23 = vector.broadcast %22 : vector<1x32xf32> to vector<32x32xf32>
    %24 = arith.addf %21, %23 : vector<32x32xf32>
    %25 = arith.truncf %24 : vector<32x32xf32> to vector<32x32xbf16>
    %26 = vector.extract_strided_slice %13 {offsets = [0, 0], sizes = [16, 8], strides = [1, 1]} : vector<32x32xbf16> to vector<16x8xbf16>
    %27 = vector.extract_strided_slice %19 {offsets = [0, 0], sizes = [16, 8], strides = [1, 1]} : vector<32x32xbf16> to vector<16x8xbf16>
    %28 = vector.extract_strided_slice %25 {offsets = [0, 0], sizes = [16, 8], strides = [1, 1]} : vector<32x32xbf16> to vector<16x8xbf16>
    %cst_19 = arith.constant dense<0.000000e+00> : vector<16x16xf32>
    %29 = tpu.matmul %26, %27, %cst_19 {dimension_numbers = #tpu.dot_dimension_numbers<[1], [1], [0], [0], [0, 0, 1, 0], [], []>} : vector<16x8xbf16>, vector<16x8xbf16>, vector<16x16xf32> -> vector<16x16xf32>
    %cst_20 = arith.constant 0.353553385 : f32
    %30 = vector.broadcast %cst_20 : f32 to vector<16x16xf32>
    %31 = arith.mulf %29, %30 : vector<16x16xf32>
    %cst_21 = arith.constant dense<0xFF800000> : vector<16xf32>
    %32 = vector.multi_reduction <maximumf>, %31, %cst_21 [1] : vector<16x16xf32> to vector<16xf32>
    %33 = vector.shape_cast %32 : vector<16xf32> to vector<16x1xf32>
    %34 = vector.broadcast %33 : vector<16x1xf32> to vector<16x16xf32>
    %35 = arith.subf %31, %34 : vector<16x16xf32>
    %36 = math.exp %35 : vector<16x16xf32>
    %cst_22 = arith.constant dense<0.000000e+00> : vector<16xf32>
    %37 = vector.multi_reduction <add>, %36, %cst_22 [1] : vector<16x16xf32> to vector<16xf32>
    %38 = vector.shape_cast %37 : vector<16xf32> to vector<16x1xf32>
    %39 = arith.truncf %36 : vector<16x16xf32> to vector<16x16xbf16>
    %cst_23 = arith.constant dense<0.000000e+00> : vector<16x8xf32>
    %40 = tpu.matmul %39, %28, %cst_23 {dimension_numbers = #tpu.dot_dimension_numbers<[1], [0], [0], [1], [0, 0, 1, 1], [], []>} : vector<16x16xbf16>, vector<16x8xbf16>, vector<16x8xf32> -> vector<16x8xf32>
    %41 = tpu.reciprocal %38 {approx = true} : vector<16x1xf32> -> vector<16x1xf32>
    %42 = vector.broadcast %41 : vector<16x1xf32> to vector<16x8xf32>
    %43 = arith.mulf %40, %42 : vector<16x8xf32>
    %44 = arith.truncf %43 : vector<16x8xf32> to vector<16x8xbf16>
    %c0_24 = arith.constant 0 : index
    %c0_25 = arith.constant 0 : index
    %45 = vector.load %arg9[%c0_24, %c0_25] : memref<32x32xbf16, #tpu.memory_space<vmem>>, vector<8x32xbf16>
    %cst_26 = arith.constant dense<0.000000e+00> : vector<16x32xf32>
    %46 = tpu.matmul %44, %45, %cst_26 {dimension_numbers = #tpu.dot_dimension_numbers<[1], [0], [0], [1], [0, 0, 1, 1], [], []>} : vector<16x8xbf16>, vector<8x32xbf16>, vector<16x32xf32> -> vector<16x32xf32>
    %47 = vector.extract_strided_slice %13 {offsets = [0, 8], sizes = [16, 8], strides = [1, 1]} : vector<32x32xbf16> to vector<16x8xbf16>
    %48 = vector.extract_strided_slice %19 {offsets = [0, 8], sizes = [16, 8], strides = [1, 1]} : vector<32x32xbf16> to vector<16x8xbf16>
    %49 = vector.extract_strided_slice %25 {offsets = [0, 8], sizes = [16, 8], strides = [1, 1]} : vector<32x32xbf16> to vector<16x8xbf16>
    %cst_27 = arith.constant dense<0.000000e+00> : vector<16x16xf32>
    %50 = tpu.matmul %47, %48, %cst_27 {dimension_numbers = #tpu.dot_dimension_numbers<[1], [1], [0], [0], [0, 0, 1, 0], [], []>} : vector<16x8xbf16>, vector<16x8xbf16>, vector<16x16xf32> -> vector<16x16xf32>
    %cst_28 = arith.constant 0.353553385 : f32
    %51 = vector.broadcast %cst_28 : f32 to vector<16x16xf32>
    %52 = arith.mulf %50, %51 : vector<16x16xf32>
    %cst_29 = arith.constant dense<0xFF800000> : vector<16xf32>
    %53 = vector.multi_reduction <maximumf>, %52, %cst_29 [1] : vector<16x16xf32> to vector<16xf32>
    %54 = vector.shape_cast %53 : vector<16xf32> to vector<16x1xf32>
    %55 = vector.broadcast %54 : vector<16x1xf32> to vector<16x16xf32>
    %56 = arith.subf %52, %55 : vector<16x16xf32>
    %57 = math.exp %56 : vector<16x16xf32>
    %cst_30 = arith.constant dense<0.000000e+00> : vector<16xf32>
    %58 = vector.multi_reduction <add>, %57, %cst_30 [1] : vector<16x16xf32> to vector<16xf32>
    %59 = vector.shape_cast %58 : vector<16xf32> to vector<16x1xf32>
    %60 = arith.truncf %57 : vector<16x16xf32> to vector<16x16xbf16>
    %cst_31 = arith.constant dense<0.000000e+00> : vector<16x8xf32>
    %61 = tpu.matmul %60, %49, %cst_31 {dimension_numbers = #tpu.dot_dimension_numbers<[1], [0], [0], [1], [0, 0, 1, 1], [], []>} : vector<16x16xbf16>, vector<16x8xbf16>, vector<16x8xf32> -> vector<16x8xf32>
    %62 = tpu.reciprocal %59 {approx = true} : vector<16x1xf32> -> vector<16x1xf32>
    %63 = vector.broadcast %62 : vector<16x1xf32> to vector<16x8xf32>
    %64 = arith.mulf %61, %63 : vector<16x8xf32>
    %65 = arith.truncf %64 : vector<16x8xf32> to vector<16x8xbf16>
    %c8 = arith.constant 8 : index
    %c0_32 = arith.constant 0 : index
    %66 = vector.load %arg9[%c8, %c0_32] : memref<32x32xbf16, #tpu.memory_space<vmem>>, vector<8x32xbf16>
    %cst_33 = arith.constant dense<0.000000e+00> : vector<16x32xf32>
    %67 = tpu.matmul %65, %66, %cst_33 {dimension_numbers = #tpu.dot_dimension_numbers<[1], [0], [0], [1], [0, 0, 1, 1], [], []>} : vector<16x8xbf16>, vector<8x32xbf16>, vector<16x32xf32> -> vector<16x32xf32>
    %68 = arith.addf %46, %67 : vector<16x32xf32>
    %69 = vector.extract_strided_slice %13 {offsets = [0, 16], sizes = [16, 8], strides = [1, 1]} : vector<32x32xbf16> to vector<16x8xbf16>
    %70 = vector.extract_strided_slice %19 {offsets = [0, 16], sizes = [16, 8], strides = [1, 1]} : vector<32x32xbf16> to vector<16x8xbf16>
    %71 = vector.extract_strided_slice %25 {offsets = [0, 16], sizes = [16, 8], strides = [1, 1]} : vector<32x32xbf16> to vector<16x8xbf16>
    %cst_34 = arith.constant dense<0.000000e+00> : vector<16x16xf32>
    %72 = tpu.matmul %69, %70, %cst_34 {dimension_numbers = #tpu.dot_dimension_numbers<[1], [1], [0], [0], [0, 0, 1, 0], [], []>} : vector<16x8xbf16>, vector<16x8xbf16>, vector<16x16xf32> -> vector<16x16xf32>
    %cst_35 = arith.constant 0.353553385 : f32
    %73 = vector.broadcast %cst_35 : f32 to vector<16x16xf32>
    %74 = arith.mulf %72, %73 : vector<16x16xf32>
    %cst_36 = arith.constant dense<0xFF800000> : vector<16xf32>
    %75 = vector.multi_reduction <maximumf>, %74, %cst_36 [1] : vector<16x16xf32> to vector<16xf32>
    %76 = vector.shape_cast %75 : vector<16xf32> to vector<16x1xf32>
    %77 = vector.broadcast %76 : vector<16x1xf32> to vector<16x16xf32>
    %78 = arith.subf %74, %77 : vector<16x16xf32>
    %79 = math.exp %78 : vector<16x16xf32>
    %cst_37 = arith.constant dense<0.000000e+00> : vector<16xf32>
    %80 = vector.multi_reduction <add>, %79, %cst_37 [1] : vector<16x16xf32> to vector<16xf32>
    %81 = vector.shape_cast %80 : vector<16xf32> to vector<16x1xf32>
    %82 = arith.truncf %79 : vector<16x16xf32> to vector<16x16xbf16>
    %cst_38 = arith.constant dense<0.000000e+00> : vector<16x8xf32>
    %83 = tpu.matmul %82, %71, %cst_38 {dimension_numbers = #tpu.dot_dimension_numbers<[1], [0], [0], [1], [0, 0, 1, 1], [], []>} : vector<16x16xbf16>, vector<16x8xbf16>, vector<16x8xf32> -> vector<16x8xf32>
    %84 = tpu.reciprocal %81 {approx = true} : vector<16x1xf32> -> vector<16x1xf32>
    %85 = vector.broadcast %84 : vector<16x1xf32> to vector<16x8xf32>
    %86 = arith.mulf %83, %85 : vector<16x8xf32>
    %87 = arith.truncf %86 : vector<16x8xf32> to vector<16x8xbf16>
    %c16 = arith.constant 16 : index
    %c0_39 = arith.constant 0 : index
    %88 = vector.load %arg9[%c16, %c0_39] : memref<32x32xbf16, #tpu.memory_space<vmem>>, vector<8x32xbf16>
    %cst_40 = arith.constant dense<0.000000e+00> : vector<16x32xf32>
    %89 = tpu.matmul %87, %88, %cst_40 {dimension_numbers = #tpu.dot_dimension_numbers<[1], [0], [0], [1], [0, 0, 1, 1], [], []>} : vector<16x8xbf16>, vector<8x32xbf16>, vector<16x32xf32> -> vector<16x32xf32>
    %90 = arith.addf %68, %89 : vector<16x32xf32>
    %91 = vector.extract_strided_slice %13 {offsets = [0, 24], sizes = [16, 8], strides = [1, 1]} : vector<32x32xbf16> to vector<16x8xbf16>
    %92 = vector.extract_strided_slice %19 {offsets = [0, 24], sizes = [16, 8], strides = [1, 1]} : vector<32x32xbf16> to vector<16x8xbf16>
    %93 = vector.extract_strided_slice %25 {offsets = [0, 24], sizes = [16, 8], strides = [1, 1]} : vector<32x32xbf16> to vector<16x8xbf16>
    %cst_41 = arith.constant dense<0.000000e+00> : vector<16x16xf32>
    %94 = tpu.matmul %91, %92, %cst_41 {dimension_numbers = #tpu.dot_dimension_numbers<[1], [1], [0], [0], [0, 0, 1, 0], [], []>} : vector<16x8xbf16>, vector<16x8xbf16>, vector<16x16xf32> -> vector<16x16xf32>
    %cst_42 = arith.constant 0.353553385 : f32
    %95 = vector.broadcast %cst_42 : f32 to vector<16x16xf32>
    %96 = arith.mulf %94, %95 : vector<16x16xf32>
    %cst_43 = arith.constant dense<0xFF800000> : vector<16xf32>
    %97 = vector.multi_reduction <maximumf>, %96, %cst_43 [1] : vector<16x16xf32> to vector<16xf32>
    %98 = vector.shape_cast %97 : vector<16xf32> to vector<16x1xf32>
    %99 = vector.broadcast %98 : vector<16x1xf32> to vector<16x16xf32>
    %100 = arith.subf %96, %99 : vector<16x16xf32>
    %101 = math.exp %100 : vector<16x16xf32>
    %cst_44 = arith.constant dense<0.000000e+00> : vector<16xf32>
    %102 = vector.multi_reduction <add>, %101, %cst_44 [1] : vector<16x16xf32> to vector<16xf32>
    %103 = vector.shape_cast %102 : vector<16xf32> to vector<16x1xf32>
    %104 = arith.truncf %101 : vector<16x16xf32> to vector<16x16xbf16>
    %cst_45 = arith.constant dense<0.000000e+00> : vector<16x8xf32>
    %105 = tpu.matmul %104, %93, %cst_45 {dimension_numbers = #tpu.dot_dimension_numbers<[1], [0], [0], [1], [0, 0, 1, 1], [], []>} : vector<16x16xbf16>, vector<16x8xbf16>, vector<16x8xf32> -> vector<16x8xf32>
    %106 = tpu.reciprocal %103 {approx = true} : vector<16x1xf32> -> vector<16x1xf32>
    %107 = vector.broadcast %106 : vector<16x1xf32> to vector<16x8xf32>
    %108 = arith.mulf %105, %107 : vector<16x8xf32>
    %109 = arith.truncf %108 : vector<16x8xf32> to vector<16x8xbf16>
    %c24 = arith.constant 24 : index
    %c0_46 = arith.constant 0 : index
    %110 = vector.load %arg9[%c24, %c0_46] : memref<32x32xbf16, #tpu.memory_space<vmem>>, vector<8x32xbf16>
    %cst_47 = arith.constant dense<0.000000e+00> : vector<16x32xf32>
    %111 = tpu.matmul %109, %110, %cst_47 {dimension_numbers = #tpu.dot_dimension_numbers<[1], [0], [0], [1], [0, 0, 1, 1], [], []>} : vector<16x8xbf16>, vector<8x32xbf16>, vector<16x32xf32> -> vector<16x32xf32>
    %112 = arith.addf %90, %111 : vector<16x32xf32>
    %113 = vector.extract_strided_slice %13 {offsets = [16, 0], sizes = [16, 8], strides = [1, 1]} : vector<32x32xbf16> to vector<16x8xbf16>
    %114 = vector.extract_strided_slice %19 {offsets = [16, 0], sizes = [16, 8], strides = [1, 1]} : vector<32x32xbf16> to vector<16x8xbf16>
    %115 = vector.extract_strided_slice %25 {offsets = [16, 0], sizes = [16, 8], strides = [1, 1]} : vector<32x32xbf16> to vector<16x8xbf16>
    %cst_48 = arith.constant dense<0.000000e+00> : vector<16x16xf32>
    %116 = tpu.matmul %113, %114, %cst_48 {dimension_numbers = #tpu.dot_dimension_numbers<[1], [1], [0], [0], [0, 0, 1, 0], [], []>} : vector<16x8xbf16>, vector<16x8xbf16>, vector<16x16xf32> -> vector<16x16xf32>
    %cst_49 = arith.constant 0.353553385 : f32
    %117 = vector.broadcast %cst_49 : f32 to vector<16x16xf32>
    %118 = arith.mulf %116, %117 : vector<16x16xf32>
    %cst_50 = arith.constant dense<0xFF800000> : vector<16xf32>
    %119 = vector.multi_reduction <maximumf>, %118, %cst_50 [1] : vector<16x16xf32> to vector<16xf32>
    %120 = vector.shape_cast %119 : vector<16xf32> to vector<16x1xf32>
    %121 = vector.broadcast %120 : vector<16x1xf32> to vector<16x16xf32>
    %122 = arith.subf %118, %121 : vector<16x16xf32>
    %123 = math.exp %122 : vector<16x16xf32>
    %cst_51 = arith.constant dense<0.000000e+00> : vector<16xf32>
    %124 = vector.multi_reduction <add>, %123, %cst_51 [1] : vector<16x16xf32> to vector<16xf32>
    %125 = vector.shape_cast %124 : vector<16xf32> to vector<16x1xf32>
    %126 = arith.truncf %123 : vector<16x16xf32> to vector<16x16xbf16>
    %cst_52 = arith.constant dense<0.000000e+00> : vector<16x8xf32>
    %127 = tpu.matmul %126, %115, %cst_52 {dimension_numbers = #tpu.dot_dimension_numbers<[1], [0], [0], [1], [0, 0, 1, 1], [], []>} : vector<16x16xbf16>, vector<16x8xbf16>, vector<16x8xf32> -> vector<16x8xf32>
    %128 = tpu.reciprocal %125 {approx = true} : vector<16x1xf32> -> vector<16x1xf32>
    %129 = vector.broadcast %128 : vector<16x1xf32> to vector<16x8xf32>
    %130 = arith.mulf %127, %129 : vector<16x8xf32>
    %131 = arith.truncf %130 : vector<16x8xf32> to vector<16x8xbf16>
    %c0_53 = arith.constant 0 : index
    %c0_54 = arith.constant 0 : index
    %132 = vector.load %arg9[%c0_53, %c0_54] : memref<32x32xbf16, #tpu.memory_space<vmem>>, vector<8x32xbf16>
    %cst_55 = arith.constant dense<0.000000e+00> : vector<16x32xf32>
    %133 = tpu.matmul %131, %132, %cst_55 {dimension_numbers = #tpu.dot_dimension_numbers<[1], [0], [0], [1], [0, 0, 1, 1], [], []>} : vector<16x8xbf16>, vector<8x32xbf16>, vector<16x32xf32> -> vector<16x32xf32>
    %134 = vector.extract_strided_slice %13 {offsets = [16, 8], sizes = [16, 8], strides = [1, 1]} : vector<32x32xbf16> to vector<16x8xbf16>
    %135 = vector.extract_strided_slice %19 {offsets = [16, 8], sizes = [16, 8], strides = [1, 1]} : vector<32x32xbf16> to vector<16x8xbf16>
    %136 = vector.extract_strided_slice %25 {offsets = [16, 8], sizes = [16, 8], strides = [1, 1]} : vector<32x32xbf16> to vector<16x8xbf16>
    %cst_56 = arith.constant dense<0.000000e+00> : vector<16x16xf32>
    %137 = tpu.matmul %134, %135, %cst_56 {dimension_numbers = #tpu.dot_dimension_numbers<[1], [1], [0], [0], [0, 0, 1, 0], [], []>} : vector<16x8xbf16>, vector<16x8xbf16>, vector<16x16xf32> -> vector<16x16xf32>
    %cst_57 = arith.constant 0.353553385 : f32
    %138 = vector.broadcast %cst_57 : f32 to vector<16x16xf32>
    %139 = arith.mulf %137, %138 : vector<16x16xf32>
    %cst_58 = arith.constant dense<0xFF800000> : vector<16xf32>
    %140 = vector.multi_reduction <maximumf>, %139, %cst_58 [1] : vector<16x16xf32> to vector<16xf32>
    %141 = vector.shape_cast %140 : vector<16xf32> to vector<16x1xf32>
    %142 = vector.broadcast %141 : vector<16x1xf32> to vector<16x16xf32>
    %143 = arith.subf %139, %142 : vector<16x16xf32>
    %144 = math.exp %143 : vector<16x16xf32>
    %cst_59 = arith.constant dense<0.000000e+00> : vector<16xf32>
    %145 = vector.multi_reduction <add>, %144, %cst_59 [1] : vector<16x16xf32> to vector<16xf32>
    %146 = vector.shape_cast %145 : vector<16xf32> to vector<16x1xf32>
    %147 = arith.truncf %144 : vector<16x16xf32> to vector<16x16xbf16>
    %cst_60 = arith.constant dense<0.000000e+00> : vector<16x8xf32>
    %148 = tpu.matmul %147, %136, %cst_60 {dimension_numbers = #tpu.dot_dimension_numbers<[1], [0], [0], [1], [0, 0, 1, 1], [], []>} : vector<16x16xbf16>, vector<16x8xbf16>, vector<16x8xf32> -> vector<16x8xf32>
    %149 = tpu.reciprocal %146 {approx = true} : vector<16x1xf32> -> vector<16x1xf32>
    %150 = vector.broadcast %149 : vector<16x1xf32> to vector<16x8xf32>
    %151 = arith.mulf %148, %150 : vector<16x8xf32>
    %152 = arith.truncf %151 : vector<16x8xf32> to vector<16x8xbf16>
    %c8_61 = arith.constant 8 : index
    %c0_62 = arith.constant 0 : index
    %153 = vector.load %arg9[%c8_61, %c0_62] : memref<32x32xbf16, #tpu.memory_space<vmem>>, vector<8x32xbf16>
    %cst_63 = arith.constant dense<0.000000e+00> : vector<16x32xf32>
    %154 = tpu.matmul %152, %153, %cst_63 {dimension_numbers = #tpu.dot_dimension_numbers<[1], [0], [0], [1], [0, 0, 1, 1], [], []>} : vector<16x8xbf16>, vector<8x32xbf16>, vector<16x32xf32> -> vector<16x32xf32>
    %155 = arith.addf %133, %154 : vector<16x32xf32>
    %156 = vector.extract_strided_slice %13 {offsets = [16, 16], sizes = [16, 8], strides = [1, 1]} : vector<32x32xbf16> to vector<16x8xbf16>
    %157 = vector.extract_strided_slice %19 {offsets = [16, 16], sizes = [16, 8], strides = [1, 1]} : vector<32x32xbf16> to vector<16x8xbf16>
    %158 = vector.extract_strided_slice %25 {offsets = [16, 16], sizes = [16, 8], strides = [1, 1]} : vector<32x32xbf16> to vector<16x8xbf16>
    %cst_64 = arith.constant dense<0.000000e+00> : vector<16x16xf32>
    %159 = tpu.matmul %156, %157, %cst_64 {dimension_numbers = #tpu.dot_dimension_numbers<[1], [1], [0], [0], [0, 0, 1, 0], [], []>} : vector<16x8xbf16>, vector<16x8xbf16>, vector<16x16xf32> -> vector<16x16xf32>
    %cst_65 = arith.constant 0.353553385 : f32
    %160 = vector.broadcast %cst_65 : f32 to vector<16x16xf32>
    %161 = arith.mulf %159, %160 : vector<16x16xf32>
    %cst_66 = arith.constant dense<0xFF800000> : vector<16xf32>
    %162 = vector.multi_reduction <maximumf>, %161, %cst_66 [1] : vector<16x16xf32> to vector<16xf32>
    %163 = vector.shape_cast %162 : vector<16xf32> to vector<16x1xf32>
    %164 = vector.broadcast %163 : vector<16x1xf32> to vector<16x16xf32>
    %165 = arith.subf %161, %164 : vector<16x16xf32>
    %166 = math.exp %165 : vector<16x16xf32>
    %cst_67 = arith.constant dense<0.000000e+00> : vector<16xf32>
    %167 = vector.multi_reduction <add>, %166, %cst_67 [1] : vector<16x16xf32> to vector<16xf32>
    %168 = vector.shape_cast %167 : vector<16xf32> to vector<16x1xf32>
    %169 = arith.truncf %166 : vector<16x16xf32> to vector<16x16xbf16>
    %cst_68 = arith.constant dense<0.000000e+00> : vector<16x8xf32>
    %170 = tpu.matmul %169, %158, %cst_68 {dimension_numbers = #tpu.dot_dimension_numbers<[1], [0], [0], [1], [0, 0, 1, 1], [], []>} : vector<16x16xbf16>, vector<16x8xbf16>, vector<16x8xf32> -> vector<16x8xf32>
    %171 = tpu.reciprocal %168 {approx = true} : vector<16x1xf32> -> vector<16x1xf32>
    %172 = vector.broadcast %171 : vector<16x1xf32> to vector<16x8xf32>
    %173 = arith.mulf %170, %172 : vector<16x8xf32>
    %174 = arith.truncf %173 : vector<16x8xf32> to vector<16x8xbf16>
    %c16_69 = arith.constant 16 : index
    %c0_70 = arith.constant 0 : index
    %175 = vector.load %arg9[%c16_69, %c0_70] : memref<32x32xbf16, #tpu.memory_space<vmem>>, vector<8x32xbf16>
    %cst_71 = arith.constant dense<0.000000e+00> : vector<16x32xf32>
    %176 = tpu.matmul %174, %175, %cst_71 {dimension_numbers = #tpu.dot_dimension_numbers<[1], [0], [0], [1], [0, 0, 1, 1], [], []>} : vector<16x8xbf16>, vector<8x32xbf16>, vector<16x32xf32> -> vector<16x32xf32>
    %177 = arith.addf %155, %176 : vector<16x32xf32>
    %178 = vector.extract_strided_slice %13 {offsets = [16, 24], sizes = [16, 8], strides = [1, 1]} : vector<32x32xbf16> to vector<16x8xbf16>
    %179 = vector.extract_strided_slice %19 {offsets = [16, 24], sizes = [16, 8], strides = [1, 1]} : vector<32x32xbf16> to vector<16x8xbf16>
    %180 = vector.extract_strided_slice %25 {offsets = [16, 24], sizes = [16, 8], strides = [1, 1]} : vector<32x32xbf16> to vector<16x8xbf16>
    %cst_72 = arith.constant dense<0.000000e+00> : vector<16x16xf32>
    %181 = tpu.matmul %178, %179, %cst_72 {dimension_numbers = #tpu.dot_dimension_numbers<[1], [1], [0], [0], [0, 0, 1, 0], [], []>} : vector<16x8xbf16>, vector<16x8xbf16>, vector<16x16xf32> -> vector<16x16xf32>
    %cst_73 = arith.constant 0.353553385 : f32
    %182 = vector.broadcast %cst_73 : f32 to vector<16x16xf32>
    %183 = arith.mulf %181, %182 : vector<16x16xf32>
    %cst_74 = arith.constant dense<0xFF800000> : vector<16xf32>
    %184 = vector.multi_reduction <maximumf>, %183, %cst_74 [1] : vector<16x16xf32> to vector<16xf32>
    %185 = vector.shape_cast %184 : vector<16xf32> to vector<16x1xf32>
    %186 = vector.broadcast %185 : vector<16x1xf32> to vector<16x16xf32>
    %187 = arith.subf %183, %186 : vector<16x16xf32>
    %188 = math.exp %187 : vector<16x16xf32>
    %cst_75 = arith.constant dense<0.000000e+00> : vector<16xf32>
    %189 = vector.multi_reduction <add>, %188, %cst_75 [1] : vector<16x16xf32> to vector<16xf32>
    %190 = vector.shape_cast %189 : vector<16xf32> to vector<16x1xf32>
    %191 = arith.truncf %188 : vector<16x16xf32> to vector<16x16xbf16>
    %cst_76 = arith.constant dense<0.000000e+00> : vector<16x8xf32>
    %192 = tpu.matmul %191, %180, %cst_76 {dimension_numbers = #tpu.dot_dimension_numbers<[1], [0], [0], [1], [0, 0, 1, 1], [], []>} : vector<16x16xbf16>, vector<16x8xbf16>, vector<16x8xf32> -> vector<16x8xf32>
    %193 = tpu.reciprocal %190 {approx = true} : vector<16x1xf32> -> vector<16x1xf32>
    %194 = vector.broadcast %193 : vector<16x1xf32> to vector<16x8xf32>
    %195 = arith.mulf %192, %194 : vector<16x8xf32>
    %196 = arith.truncf %195 : vector<16x8xf32> to vector<16x8xbf16>
    %c24_77 = arith.constant 24 : index
    %c0_78 = arith.constant 0 : index
    %197 = vector.load %arg9[%c24_77, %c0_78] : memref<32x32xbf16, #tpu.memory_space<vmem>>, vector<8x32xbf16>
    %cst_79 = arith.constant dense<0.000000e+00> : vector<16x32xf32>
    %198 = tpu.matmul %196, %197, %cst_79 {dimension_numbers = #tpu.dot_dimension_numbers<[1], [0], [0], [1], [0, 0, 1, 1], [], []>} : vector<16x8xbf16>, vector<8x32xbf16>, vector<16x32xf32> -> vector<16x32xf32>
    %199 = arith.addf %177, %198 : vector<16x32xf32>
    %200 = tpu.concatenate %112, %199 in 0 : vector<16x32xf32>, vector<16x32xf32> -> vector<32x32xf32>
    %c0_80 = arith.constant 0 : index
    %c0_81 = arith.constant 0 : index
    %201 = vector.load %arg10[%c0_80, %c0_81] : memref<1x32xf32, #tpu.memory_space<vmem>>, vector<1x32xf32>
    %202 = vector.broadcast %201 : vector<1x32xf32> to vector<32x32xf32>
    %203 = arith.addf %200, %202 : vector<32x32xf32>
    %204 = arith.addf %2, %203 : vector<32x32xf32>
    %c0_82 = arith.constant 0 : index
    %c0_83 = arith.constant 0 : index
    %205 = vector.load %arg11[%c0_82, %c0_83] : memref<1x32xf32, #tpu.memory_space<vmem>>, vector<1x32xf32>
    %c0_84 = arith.constant 0 : index
    %c0_85 = arith.constant 0 : index
    %206 = vector.load %arg12[%c0_84, %c0_85] : memref<1x32xf32, #tpu.memory_space<vmem>>, vector<1x32xf32>
    %cst_86 = arith.constant dense<0.000000e+00> : vector<32xf32>
    %207 = vector.multi_reduction <add>, %204, %cst_86 [1] : vector<32x32xf32> to vector<32xf32>
    %208 = vector.shape_cast %207 : vector<32xf32> to vector<32x1xf32>
    %cst_87 = arith.constant 3.200000e+01 : f32
    %209 = vector.broadcast %cst_87 : f32 to vector<32x1xf32>
    %210 = arith.divf %208, %209 : vector<32x1xf32>
    %211 = vector.broadcast %210 : vector<32x1xf32> to vector<32x32xf32>
    %212 = arith.subf %204, %211 : vector<32x32xf32>
    %213 = arith.mulf %212, %212 : vector<32x32xf32>
    %cst_88 = arith.constant dense<0.000000e+00> : vector<32xf32>
    %214 = vector.multi_reduction <add>, %213, %cst_88 [1] : vector<32x32xf32> to vector<32xf32>
    %215 = vector.shape_cast %214 : vector<32xf32> to vector<32x1xf32>
    %cst_89 = arith.constant 3.200000e+01 : f32
    %216 = vector.broadcast %cst_89 : f32 to vector<32x1xf32>
    %217 = arith.divf %215, %216 : vector<32x1xf32>
    %cst_90 = arith.constant 9.99999974E-6 : f32
    %218 = vector.broadcast %cst_90 : f32 to vector<32x1xf32>
    %219 = arith.addf %217, %218 : vector<32x1xf32>
    %220 = math.rsqrt %219 : vector<32x1xf32>
    %221 = vector.broadcast %220 : vector<32x1xf32> to vector<32x32xf32>
    %222 = arith.mulf %212, %221 : vector<32x32xf32>
    %223 = vector.broadcast %205 : vector<1x32xf32> to vector<32x32xf32>
    %224 = arith.mulf %222, %223 : vector<32x32xf32>
    %225 = vector.broadcast %206 : vector<1x32xf32> to vector<32x32xf32>
    %226 = arith.addf %224, %225 : vector<32x32xf32>
    %227 = arith.truncf %226 : vector<32x32xf32> to vector<32x32xbf16>
    %c0_91 = arith.constant 0 : index
    %c0_92 = arith.constant 0 : index
    %228 = vector.load %arg13[%c0_91, %c0_92] : memref<32x64xbf16, #tpu.memory_space<vmem>>, vector<32x64xbf16>
    %cst_93 = arith.constant dense<0.000000e+00> : vector<32x64xf32>
    %229 = tpu.matmul %227, %228, %cst_93 {dimension_numbers = #tpu.dot_dimension_numbers<[1], [0], [0], [1], [0, 0, 1, 1], [], []>} : vector<32x32xbf16>, vector<32x64xbf16>, vector<32x64xf32> -> vector<32x64xf32>
    %c0_94 = arith.constant 0 : index
    %c0_95 = arith.constant 0 : index
    %230 = vector.load %arg14[%c0_94, %c0_95] : memref<1x64xf32, #tpu.memory_space<vmem>>, vector<1x64xf32>
    %231 = vector.broadcast %230 : vector<1x64xf32> to vector<32x64xf32>
    %232 = arith.addf %229, %231 : vector<32x64xf32>
    %cst_96 = arith.constant 0.000000e+00 : f32
    %233 = vector.broadcast %cst_96 : f32 to vector<32x64xf32>
    %234 = arith.maximumf %232, %233 : vector<32x64xf32>
    %235 = arith.truncf %234 : vector<32x64xf32> to vector<32x64xbf16>
    %c0_97 = arith.constant 0 : index
    %c0_98 = arith.constant 0 : index
    %236 = vector.load %arg15[%c0_97, %c0_98] : memref<64x32xbf16, #tpu.memory_space<vmem>>, vector<64x32xbf16>
    %cst_99 = arith.constant dense<0.000000e+00> : vector<32x32xf32>
    %237 = tpu.matmul %235, %236, %cst_99 {dimension_numbers = #tpu.dot_dimension_numbers<[1], [0], [0], [1], [0, 0, 1, 1], [], []>} : vector<32x64xbf16>, vector<64x32xbf16>, vector<32x32xf32> -> vector<32x32xf32>
    %c0_100 = arith.constant 0 : index
    %c0_101 = arith.constant 0 : index
    %238 = vector.load %arg16[%c0_100, %c0_101] : memref<1x32xf32, #tpu.memory_space<vmem>>, vector<1x32xf32>
    %239 = vector.broadcast %238 : vector<1x32xf32> to vector<32x32xf32>
    %240 = arith.addf %237, %239 : vector<32x32xf32>
    %241 = arith.addf %226, %240 : vector<32x32xf32>
    %c0_102 = arith.constant 0 : index
    %c0_103 = arith.constant 0 : index
    %242 = vector.load %arg17[%c0_102, %c0_103] : memref<1x32xf32, #tpu.memory_space<vmem>>, vector<1x32xf32>
    %c0_104 = arith.constant 0 : index
    %c0_105 = arith.constant 0 : index
    %243 = vector.load %arg18[%c0_104, %c0_105] : memref<1x32xf32, #tpu.memory_space<vmem>>, vector<1x32xf32>
    %cst_106 = arith.constant dense<0.000000e+00> : vector<32xf32>
    %244 = vector.multi_reduction <add>, %241, %cst_106 [1] : vector<32x32xf32> to vector<32xf32>
    %245 = vector.shape_cast %244 : vector<32xf32> to vector<32x1xf32>
    %cst_107 = arith.constant 3.200000e+01 : f32
    %246 = vector.broadcast %cst_107 : f32 to vector<32x1xf32>
    %247 = arith.divf %245, %246 : vector<32x1xf32>
    %248 = vector.broadcast %247 : vector<32x1xf32> to vector<32x32xf32>
    %249 = arith.subf %241, %248 : vector<32x32xf32>
    %250 = arith.mulf %249, %249 : vector<32x32xf32>
    %cst_108 = arith.constant dense<0.000000e+00> : vector<32xf32>
    %251 = vector.multi_reduction <add>, %250, %cst_108 [1] : vector<32x32xf32> to vector<32xf32>
    %252 = vector.shape_cast %251 : vector<32xf32> to vector<32x1xf32>
    %cst_109 = arith.constant 3.200000e+01 : f32
    %253 = vector.broadcast %cst_109 : f32 to vector<32x1xf32>
    %254 = arith.divf %252, %253 : vector<32x1xf32>
    %cst_110 = arith.constant 9.99999974E-6 : f32
    %255 = vector.broadcast %cst_110 : f32 to vector<32x1xf32>
    %256 = arith.addf %254, %255 : vector<32x1xf32>
    %257 = math.rsqrt %256 : vector<32x1xf32>
    %258 = vector.broadcast %257 : vector<32x1xf32> to vector<32x32xf32>
    %259 = arith.mulf %249, %258 : vector<32x32xf32>
    %260 = vector.broadcast %242 : vector<1x32xf32> to vector<32x32xf32>
    %261 = arith.mulf %259, %260 : vector<32x32xf32>
    %262 = vector.broadcast %243 : vector<1x32xf32> to vector<32x32xf32>
    %263 = arith.addf %261, %262 : vector<32x32xf32>
    %264 = vector.shape_cast %263 : vector<32x32xf32> to vector<2x16x32xf32>
    %265 = arith.truncf %264 : vector<2x16x32xf32> to vector<2x16x32xbf16>
    %c0_111 = arith.constant 0 : index
    %c0_112 = arith.constant 0 : index
    %c0_113 = arith.constant 0 : index
    %266 = vector.load %arg19[%c0_111, %c0_112, %c0_113] : memref<2x16x32xbf16, #tpu.memory_space<vmem>>, vector<2x16x32xbf16>
    tpu.vector_store %arg19[%c0_111, %c0_112, %c0_113], %265 {strides = array<i32>} : memref<2x16x32xbf16, #tpu.memory_space<vmem>>, vector<2x16x32xbf16>,
    return
  }
  func.func @transform_0(%arg0: i32) -> (i32, i32, i32) {
    %c0_i32 = arith.constant 0 : i32
    %c0_i32_0 = arith.constant 0 : i32
    %c0_i32_1 = arith.constant 0 : i32
    return %arg0, %c0_i32, %c0_i32_0 : i32, i32, i32
  }
  func.func @transform_1(%arg0: i32) -> (i32, i32, i32) {
    %c0_i32 = arith.constant 0 : i32
    %c0_i32_0 = arith.constant 0 : i32
    %c0_i32_1 = arith.constant 0 : i32
    return %arg0, %c0_i32, %c0_i32_0 : i32, i32, i32
  }
  func.func @transform_2(%arg0: i32) -> (i32, i32) {
    %c0_i32 = arith.constant 0 : i32
    %c0_i32_0 = arith.constant 0 : i32
    %c0_i32_1 = arith.constant 0 : i32
    return %c0_i32, %c0_i32_0 : i32, i32
  }
  func.func @transform_3(%arg0: i32) -> (i32, i32) {
    %c0_i32 = arith.constant 0 : i32
    %c0_i32_0 = arith.constant 0 : i32
    %c0_i32_1 = arith.constant 0 : i32
    return %c0_i32, %c0_i32_0 : i32, i32
  }
  func.func @transform_4(%arg0: i32) -> (i32, i32) {
    %c0_i32 = arith.constant 0 : i32
    %c0_i32_0 = arith.constant 0 : i32
    %c0_i32_1 = arith.constant 0 : i32
    return %c0_i32, %c0_i32_0 : i32, i32
  }
  func.func @transform_5(%arg0: i32) -> (i32, i32) {
    %c0_i32 = arith.constant 0 : i32
    %c0_i32_0 = arith.constant 0 : i32
    %c0_i32_1 = arith.constant 0 : i32
    return %c0_i32, %c0_i32_0 : i32, i32
  }
  func.func @transform_6(%arg0: i32) -> (i32, i32) {
    %c0_i32 = arith.constant 0 : i32
    %c0_i32_0 = arith.constant 0 : i32
    %c0_i32_1 = arith.constant 0 : i32
    return %c0_i32, %c0_i32_0 : i32, i32
  }
  func.func @transform_7(%arg0: i32) -> (i32, i32) {
    %c0_i32 = arith.constant 0 : i32
    %c0_i32_0 = arith.constant 0 : i32
    %c0_i32_1 = arith.constant 0 : i32
    return %c0_i32, %c0_i32_0 : i32, i32
  }
  func.func @transform_8(%arg0: i32) -> (i32, i32) {
    %c0_i32 = arith.constant 0 : i32
    %c0_i32_0 = arith.constant 0 : i32
    %c0_i32_1 = arith.constant 0 : i32
    return %c0_i32, %c0_i32_0 : i32, i32
  }
  func.func @transform_9(%arg0: i32) -> (i32, i32) {
    %c0_i32 = arith.constant 0 : i32
    %c0_i32_0 = arith.constant 0 : i32
    %c0_i32_1 = arith.constant 0 : i32
    return %c0_i32, %c0_i32_0 : i32, i32
  }
  func.func @transform_10(%arg0: i32) -> (i32, i32) {
    %c0_i32 = arith.constant 0 : i32
    %c0_i32_0 = arith.constant 0 : i32
    %c0_i32_1 = arith.constant 0 : i32
    return %c0_i32, %c0_i32_0 : i32, i32
  }
  func.func @transform_11(%arg0: i32) -> (i32, i32) {
    %c0_i32 = arith.constant 0 : i32
    %c0_i32_0 = arith.constant 0 : i32
    %c0_i32_1 = arith.constant 0 : i32
    return %c0_i32, %c0_i32_0 : i32, i32
  }
  func.func @transform_12(%arg0: i32) -> (i32, i32) {
    %c0_i32 = arith.constant 0 : i32
    %c0_i32_0 = arith.constant 0 : i32
    %c0_i32_1 = arith.constant 0 : i32
    return %c0_i32, %c0_i32_0 : i32, i32
  }
  func.func @transform_13(%arg0: i32) -> (i32, i32) {
    %c0_i32 = arith.constant 0 : i32
    %c0_i32_0 = arith.constant 0 : i32
    %c0_i32_1 = arith.constant 0 : i32
    return %c0_i32, %c0_i32_0 : i32, i32
  }
  func.func @transform_14(%arg0: i32) -> (i32, i32) {
    %c0_i32 = arith.constant 0 : i32
    %c0_i32_0 = arith.constant 0 : i32
    %c0_i32_1 = arith.constant 0 : i32
    return %c0_i32, %c0_i32_0 : i32, i32
  }
  func.func @transform_15(%arg0: i32) -> (i32, i32) {
    %c0_i32 = arith.constant 0 : i32
    %c0_i32_0 = arith.constant 0 : i32
    %c0_i32_1 = arith.constant 0 : i32
    return %c0_i32, %c0_i32_0 : i32, i32
  }
  func.func @transform_16(%arg0: i32) -> (i32, i32) {
    %c0_i32 = arith.constant 0 : i32
    %c0_i32_0 = arith.constant 0 : i32
    %c0_i32_1 = arith.constant 0 : i32
    return %c0_i32, %c0_i32_0 : i32, i32
  }
  func.func @transform_17(%arg0: i32) -> (i32, i32) {
    %c0_i32 = arith.constant 0 : i32
    %c0_i32_0 = arith.constant 0 : i32
    %c0_i32_1 = arith.constant 0 : i32
    return %c0_i32, %c0_i32_0 : i32, i32
  }
  func.func @transform_18(%arg0: i32) -> (i32, i32, i32) {
    %c0_i32 = arith.constant 0 : i32
    %c0_i32_0 = arith.constant 0 : i32
    %c0_i32_1 = arith.constant 0 : i32
    return %arg0, %c0_i32, %c0_i32_0 : i32, i32, i32
  }
}

</mosaic_0001>

<bundles_post_ra>
// kernel: tpu_custom_call.1
= control target key start
LH: loop header
LB: loop body
LE: loop exit
PB: predicated region body
PF: predicated region fallthrough
CT: control target
= control target key end

     0   :  { %s2231_s0 = inlined_call_operand.vmem [shape: bf16[2,16,32], index: 0, kind: input, shape index: {}]   ;;  %s2232_s1 = inlined_call_operand.vmem [shape: bf16[2,16,32], index: 1, kind: input, shape index: {}]   ;;  %s2233_s2 = inlined_call_operand.vmem [shape: bf16[32,32], index: 2, kind: input, shape index: {}]   ;;  %s2234_s3 = inlined_call_operand.vmem [shape: f32[1,32], index: 3, kind: input, shape index: {}]   ;;  %s2235_s4 = inlined_call_operand.hbm [shape: bf16[32,32], index: 4, kind: input, shape index: {}]   ;;  %s2236_s5 = inlined_call_operand.vmem [shape: f32[1,32], index: 5, kind: input, shape index: {}]   ;;  %s2237_s6 = inlined_call_operand.hbm [shape: bf16[32,32], index: 6, kind: input, shape index: {}]   ;;  %s2238_s7 = inlined_call_operand.vmem [shape: f32[1,32], index: 7, kind: input, shape index: {}]   ;;  %s2239_s8 = inlined_call_operand.hbm [shape: bf16[32,32], index: 8, kind: input, shape index: {}]   ;;  %s2240_s9 = inlined_call_operand.vmem [shape: f32[1,32], index: 9, kind: input, shape index: {}]   ;;  %s2241_s10 = inlined_call_operand.vmem [shape: f32[1,32], index: 10, kind: input, shape index: {}]   ;;  %s2242_s11 = inlined_call_operand.vmem [shape: f32[1,32], index: 11, kind: input, shape index: {}]   ;;  %s2243_s12 = inlined_call_operand.hbm [shape: bf16[32,64], index: 12, kind: input, shape index: {}]   ;;  %s2244_s13 = inlined_call_operand.vmem [shape: f32[1,64], index: 13, kind: input, shape index: {}]   ;;  %s2245_s14 = inlined_call_operand.vmem [shape: bf16[64,32], index: 14, kind: input, shape index: {}]   ;;  %s2246_s15 = inlined_call_operand.vmem [shape: f32[1,32], index: 15, kind: input, shape index: {}]   ;;  %s2247_s16 = inlined_call_operand.vmem [shape: f32[1,32], index: 16, kind: input, shape index: {}]   ;;  %s2248_s17 = inlined_call_operand.vmem [shape: f32[1,32], index: 17, kind: input, shape index: {}]   ;;  %s2249_s18 = inlined_call_operand.hbm [shape: bf16[2,16,32], index: 18, kind: output, shape index: {}]  }
   0x1   :  { %2253 = sst [smem:[#allocation15_spill]] %s2231_s0 }
   0x2   :  { %2254 = sst [smem:[#allocation16_spill]] %s2232_s1 }
   0x3   :  { %2255 = sst [smem:[#allocation17_spill]] %s2233_s2 }
   0x4   :  { %23 = vsyncpa [#allocation3], 0 }
   0x5   :  { %24 = vsyncpa [#allocation6], 0 }
   0x6   :  { %25 = vsyncpa [#allocation9], 0 }
   0x7   :  { %26 = vsyncpa [#allocation4], 0  ;;  %s54_s29 = sshll.u32 %s2237_s6, 4  ;;  %s1759_s30 = smov [#allocation5]   ;;  %s55_s29 = int_to_ptr.hbm [resolvable:$true] %s54_s29 }
   0x8   :  { %s56_s0 = sshll.u32 %s1759_s30, 4  ;;  %s39_s20 = sshll.u32 %s2235_s4, 4  ;;  %s57_s0 = int_to_ptr.vmem [resolvable:$true] %s56_s0  ;;  %s40_s20 = int_to_ptr.hbm [resolvable:$true] %s39_s20 }
   0x9   :  { %s1760_s21 = smov 64   ;;  %s1761_s22 = smov 4  }
   0xa   :  { %62 = dma.hbm_to_vmem [thread:$0]  %s55_s29, 256, %s57_s0, [#allocation6], %s1760_s21, %s1760_s21, %s1761_s22  }
   0xb   :  { %s1762_s2 = smov [#allocation2]   ;;  %s69_s6 = sshll.u32 %s2239_s8, 4  ;;  %s70_s6 = int_to_ptr.hbm [resolvable:$true] %s69_s6 }
   0xc   :  { %s41_s23 = sshll.u32 %s1762_s2, 4  ;;  %s88_s27 = sshll.u32 %s2243_s12, 4  ;;  %s42_s23 = int_to_ptr.vmem [resolvable:$true] %s41_s23  ;;  %s89_s27 = int_to_ptr.hbm [resolvable:$true] %s88_s27 }
   0xd   :  { %47 = dma.hbm_to_vmem [thread:$0]  %s40_s20, 256, %s42_s23, [#allocation3], %s1760_s21, %s1760_s21, %s1761_s22  }
   0xe   :  { %s1763_s28 = smov [#allocation7]   ;;  %s1764_s29 = smov [#allocation8]  }
   0xf   :  { %s71_s30 = sshll.u32 %s1763_s28, 4  ;;  %s90_s8 = sshll.u32 %s1764_s29, 4  ;;  %s72_s30 = int_to_ptr.vmem [resolvable:$true] %s71_s30  ;;  %s91_s8 = int_to_ptr.vmem [resolvable:$true] %s90_s8 }
  0x10   :  { %77 = dma.hbm_to_vmem [thread:$0]  %s70_s6, 256, %s72_s30, [#allocation6], %s1760_s21, %s1760_s21, %s1761_s22  }
  0x11   :  { %96 = dma.hbm_to_vmem [thread:$0]  %s89_s27, 256, %s91_s8, [#allocation9], %s1760_s21, %s1760_s21, %s1761_s22  }
  0x12   :  { %1751 = dma.done.wait [#allocation3], 256  }
  0x13   :  { %1752 = vsyncadd [#allocation3], 4294967040 }
  0x14   :  { %1753 = dma.done.wait [#allocation6], 512  }
  0x15   :  { %1754 = vsyncadd [#allocation6], 4294966784 }
  0x16   :  { %1755 = dma.done.wait [#allocation9], 256  }
  0x17   :  { %1756 = vsyncadd [#allocation9], 4294967040  ;;  %v1510_v0 = vld [vmem:[#allocation2 + $0x8] sm:$0xff]  ;;  %s2256_s19 = sld [smem:[#allocation15_spill]]  ;;  %v1509_v6 = vld [vmem:[#allocation2] sm:$0xff]  ;;  %vm166_vm0 = vcmask 261120  }
  0x18   :  { %s2257_s2 = sld [smem:[#allocation16_spill]]  ;;  %222 = vmatpush.bf16.msra.mxu1 %v1510_v0  ;;  %v1512_v10 = vld [vmem:[#allocation5 + $0x8] sm:$0xff]  ;;  %v1511_v11 = vld [vmem:[#allocation5] sm:$0xff]  ;;  %v1918_v17 = vld [vmem:[%s2236_s5] ss:$0 sm:$0xff]  ;;  %vm308_vm1 = vcmask 64512  }
  0x19   :  { %s2258_s25 = sld [smem:[#allocation17_spill]]  ;;  %281 = vmatpush.bf16.msra.mxu2 %v1512_v10  ;;  %v1938_v28 = vld [vmem:[%s2234_s3] ss:$0 sm:$0xff]  ;;  %s1765_s3 = smov 112   ;;  %vm331_vm2 = vcmask 130048   ;;  %vm454_vm3 = vcmask 1043456  }
  0x1a   :  { %v1943_v31 = vld [vmem:[%s2238_s7] ss:$0 sm:$0xff]  ;;  %s1766_s7 = smov 120   ;;  %s1767_s23 = smov 104  }
  0x1b   :  { %s1400_s24 = sshll.u32 %s2249_s18, 4  ;;  %s1401_s24 = int_to_ptr.hbm [resolvable:$true] %s1400_s24 }
  0x1c   :  { %223 = vmatpush.bf16.msra.mxu1 %v1509_v6 }
  0x1d   :  { %v1892_v1 = vld [vmem:[%s2256_s19] sm:$0xff]   ;;  %282 = vmatpush.bf16.msra.mxu2 %v1511_v11  ;;  %v1923_v19 = vld [vmem:[%s2256_s19 + $0x8] sm:$0xff]  }
  0x1e   :  { %v128_v2 = vunpack.c.l.bf16 %v1892_v1  ;;  %v129_v3 = vunpack.c.h.bf16 %v1892_v1  ;;  %v1520_v4 = vld [vmem:[%s2257_s2] sm:$0xff]   ;;  %v1527_v20 = vld [vmem:[%s2257_s2 + $0x8] sm:$0xff]   ;;  %v130_v21 = vunpack.c.l.bf16 %v1923_v19  ;;  %v131_v22 = vunpack.c.h.bf16 %v1923_v19 }
  0x1f   :  { %v1508_v5 = vld [vmem:[%s2258_s25 + $0x8] sm:$0xff]  ;;  %v1521_v7 = vunpack.c.l.bf16 %v1520_v4  ;;  %v1522_v8 = vunpack.c.h.bf16 %v1520_v4  ;;  %v1507_v9 = vld [vmem:[%s2258_s25] sm:$0xff]  ;;  %v1525_v23 = vunpack.c.l.bf16 %v1527_v20  ;;  %v1526_v24 = vunpack.c.h.bf16 %v1527_v20 }
  0x20   :  { %179 = vmatpush.bf16.msra.mxu0 %v1508_v5  ;;  %v1505_v15 = vld [vmem:[%s2256_s19] sm:$0xff] }
  0x21   :  { %v140_v12 = vadd.f32 %v1521_v7, %v128_v2  ;;  %v141_v13 = vadd.f32 %v1522_v8, %v129_v3  ;;  %1451 = vmatmul.msk.bf16.vlgmr.msra.gmra.mxu2 %vm166_vm0, %v1505_v15  ;;  %v142_v25 = vadd.f32 %v1525_v23, %v130_v21  ;;  %v143_v27 = vadd.f32 %v1526_v24, %v131_v22 }
  0x23   :  { %v144_v14 = vpack.c.bf16 %v141_v13, %v140_v12  ;;  %v145_v29 = vpack.c.bf16 %v143_v27, %v142_v25 }
  0x24   :  { %180 = vmatpush.bf16.msra.mxu0 %v1507_v9 }
  0x25   :  { %1433 = vmatmul.msk.bf16.vlgmr.msra.gmra.mxu1 %vm166_vm0, %v144_v14 }
  0x27   :  { %1423 = vmatmul.msk.bf16.vlgmr.msra.gmra.mxu0 %vm166_vm0, %v144_v14 }
  0x35   :  { %1434 = vmatmul.msk.bf16.gmra.mxu1 %vm166_vm0, %v145_v29 }
  0x37   :  { %1424 = vmatmul.msk.bf16.gmra.mxu0 %vm166_vm0, %v145_v29 }
  0xa2   :  { %v225_v16 = vpop.f32.mrf.mxu1 }
  0xa3   :  { %v226_v26 = vadd.f32 %v1918_v17, %v225_v16 }
  0xa4   :  { %v182_v18 = vpop.f32.mrf.mxu0  ;;  %v284_v32 = vpop.f32.mrf.mxu2 }
  0xa5   :  { %v235_v33 = vpack.c.bf16 %v226_v26, %v226_v26  ;;  %v183_v36 = vadd.f32 %v1938_v28, %v182_v18  ;;  %v285_v39 = vadd.f32 %v1943_v31, %v284_v32 }
  0xa7   :  { %v305_v40 = vunpack.c.l.b16 %v235_v33  ;;  %v192_v42 = vpack.c.bf16 %v183_v36, %v183_v36  ;;  %v294_v45 = vpack.c.bf16 %v285_v39, %v285_v39 }
  0xa9   :  { %v300_v49 = vunpack.c.l.b16 %v192_v42  ;;  %v353_v52 = vunpack.c.l.b16 %v294_v45 }
  0xaa   :  { %v227_v30 = vpop.f32.mrf.mxu1 }
  0xab   :  { %v228_v34 = vadd.f32 %v1918_v17, %v227_v30 }
  0xac   :  { %v184_v35 = vpop.f32.mrf.mxu0  ;;  %v286_v46 = vpop.f32.mrf.mxu2 }
  0xad   :  { %v236_v37 = vpack.c.bf16 %v228_v34, %v228_v34  ;;  %v185_v38 = vadd.f32 %v1938_v28, %v184_v35  ;;  %v287_v48 = vadd.f32 %v1943_v31, %v286_v46 }
  0xaf   :  { %v306_v41 = vunpack.c.l.b16 %v236_v37  ;;  %v193_v44 = vpack.c.bf16 %v185_v38, %v185_v38  ;;  %v295_v51 = vpack.c.bf16 %v287_v48, %v287_v48 }
  0xb1   :  { %v1951_v43 = vpack.c.b16 %v306_v41, %v305_v40  ;;  %v301_v50 = vunpack.c.l.b16 %v193_v44  ;;  %v354_v53 = vunpack.c.l.b16 %v295_v51 }
  0xb3   :  { %494 = vrot.lane.b32.xlu1 %v1951_v43, %s1765_s3  ;;  %382 = vrot.lane.b32.xlu0 %v1951_v43, %s1766_s7  ;;  %v313_v47 = vsel %vm308_vm1, %v1951_v43, 0  ;;  %v1960_v54 = vpack.c.b16 %v301_v50, %v300_v49  ;;  %v1962_v55 = vpack.c.b16 %v354_v53, %v353_v52 }
  0xb4   :  { %322 = vmatpush.bf16.xpose.msra.mxu3 %v313_v47  ;;  %v1980_v7 = vpop.f32.mrf.mxu0 }
  0xbb   :  { %380 = vrot.lane.b32.xlu0 %v1960_v54, %s1766_s7  ;;  %1453 = vmatmul.msk.bf16.vlgmr.msra.gmra.mxu3 %vm308_vm1, %v1960_v54 }
  0xbc   :  { %492 = vrot.lane.b32.xlu1 %v1960_v54, %s1765_s3  ;;  %367 = vmatpush.bf16.msrb.mxu3 %v1962_v55  ;;  %v1982_v8 = vpop.f32.mrf.mxu0 }
  0xc3   :  { %425 = vrot.lane.b32.xlu0 %v1962_v55, %s1766_s7 }
  0xcb   :  { %537 = vrot.lane.b32.xlu0 %v1962_v55, %s1765_s3 }
 0x125   :  { %v495_v56 = vpop.permute.xlu1 %494  ;;  %v383_v57 = vpop.permute.xlu0 %382 }
 0x126   :  { %v500_v58 = vsel %vm308_vm1, %v495_v56, 0  ;;  %v388_v59 = vsel %vm308_vm1, %v383_v57, 0 }
 0x127   :  { %397 = vmatpush.bf16.xpose.msrb.mxu0 %v388_v59 }
 0x12d   :  { %v381_v60 = vpop.permute.xlu0 %380 }
 0x12e   :  { %1455 = vmatmul.msk.bf16.vlgmr.msrb.gmra.mxu0 %vm308_vm1, %v381_v60  ;;  %v493_v61 = vpop.permute.xlu1 %492 }
 0x12f   :  { %509 = vmatpush.bf16.xpose.msra.mxu0 %v500_v58 }
 0x135   :  { %v426_v5 = vpop.permute.xlu0 %425 }
 0x136   :  { %438 = vmatpush.bf16.msrb.mxu1 %v426_v5  ;;  %v450_v5 = vld [vmem:[#allocation7 + $0x4] sm:$0xf] }
 0x13d   :  { %v538_v6 = vpop.permute.xlu0 %537 }
 0x13e   :  { %v324_v62 = vpop.f32.mrf.mxu3  ;;  %1459 = vmatmul.msk.bf16.vlgmr.msra.gmra.mxu0 %vm308_vm1, %v493_v61  ;;  %550 = vmatpush.bf16.msra.mxu1 %v538_v6  ;;  %v456_v6 = vsel %vm454_vm3, %v450_v5, 0 }
 0x13f   :  { %v329_v25 = vmul.f32 0.35355338, %v324_v62  ;;  %465 = vmatpush.bf16.msrb.mxu2 %v456_v6 }
 0x141   :  { %v332_v26 = vsel %vm331_vm2, %v329_v25, -inf }
 0x146   :  { %v326_v63 = vpop.f32.mrf.mxu3 }
 0x147   :  { %v330_v0 = vmul.f32 0.35355338, %v326_v63 }
 0x149   :  { %v335_v4 = vsel %vm331_vm2, %v330_v0, -inf }
 0x14a   :  { %336 = vmax.xlane.f32.xlu0 %v335_v4  ;;  %v1506_v4 = vld [vmem:[%s2256_s19 + $0x8] sm:$0xff] }
 0x14b   :  { %1452 = vmatmul.msk.bf16.gmra.mxu2 %vm166_vm0, %v1506_v4 }
 0x1ab   :  { %v399_v9 = vpop.f32.mrf.mxu0 }
 0x1ac   :  { %v404_v10 = vmul.f32 0.35355338, %v399_v9  ;;  %v562_v9 = vld [vmem:[#allocation7 + $0x8] sm:$0xf] }
 0x1ae   :  { %v406_v11 = vsel %vm331_vm2, %v404_v10, -inf }
 0x1af   :  { %407 = vmax.xlane.f32.xlu2 %v406_v11 }
 0x1b3   :  { %v401_v12 = vpop.f32.mrf.mxu0 }
 0x1b4   :  { %v405_v13 = vmul.f32 0.35355338, %v401_v12 }
 0x1b6   :  { %v409_v14 = vsel %vm331_vm2, %v405_v13, -inf }
 0x1b7   :  { %410 = vmax.xlane.f32.xlu2 %v409_v14 }
 0x1bb   :  { %v511_v15 = vpop.f32.mrf.mxu0 }
 0x1bc   :  { %v516_v16 = vmul.f32 0.35355338, %v511_v15 }
 0x1bd   :  { %v337_v44 = vpop.xlane.xlu0 %336 }
 0x1be   :  { %v518_v18 = vsel %vm331_vm2, %v516_v16, -inf  ;;  %v339_v48 = vsub.f32 %v330_v0, %v337_v44 }
 0x1bf   :  { %519 = vmax.xlane.f32.xlu1 %v518_v18 }
 0x1c0   :  { %v342_v51 = vmul.f32 1.442695, %v339_v48 }
 0x1c3   :  { %v513_v20 = vpop.f32.mrf.mxu0 }
 0x1c4   :  { %v517_v23 = vmul.f32 0.35355338, %v513_v20 }
 0x1c6   :  { %v521_v24 = vsel %vm331_vm2, %v517_v23, -inf }
 0x1c7   :  { %522 = vmax.xlane.f32.xlu2 %v521_v24 }
 0x1cf   :  { %333 = vmax.xlane.f32.xlu2 %v332_v26 }
 0x222   :  { %v408_v27 = vpop.xlane.xlu2 %407 }
 0x223   :  { %v412_v29 = vsub.f32 %v404_v10, %v408_v27 }
 0x225   :  { %v414_v30 = vmul.f32 1.442695, %v412_v29 }
 0x227   :  { %1549 = vpow2.f32 %v414_v30 }
 0x22a   :  { %v411_v32 = vpop.xlane.xlu2 %410 }
 0x22b   :  { %v413_v33 = vsub.f32 %v405_v13, %v411_v32 }
 0x22d   :  { %v1550_v34 = vpop.eup %1549  ;;  %v416_v35 = vmul.f32 1.442695, %v413_v33 }
 0x22e   :  { %v418_v36 = vsel %vm331_vm2, %v1550_v34, 0.0 }
 0x22f   :  { %1551 = vpow2.f32 %v416_v35  ;;  %419 = vadd.xlane.f32.xlu2 %v418_v36 }
 0x232   :  { %v520_v37 = vpop.xlane.xlu1 %519 }
 0x233   :  { %v524_v38 = vsub.f32 %v516_v16, %v520_v37 }
 0x235   :  { %v1552_v39 = vpop.eup %1551  ;;  %v526_v40 = vmul.f32 1.442695, %v524_v38 }
 0x236   :  { %v421_v41 = vsel %vm331_vm2, %v1552_v39, 0.0  ;;  %v424_v42 = vpack.c.bf16 %v1552_v39, %v1550_v34 }
 0x237   :  { %1553 = vpow2.f32 %v526_v40  ;;  %422 = vadd.xlane.f32.xlu2 %v421_v41 }
 0x238   :  { %1456 = vmatmul.msk.bf16.vlgmr.msrb.gmra.mxu1 %vm331_vm2, %v424_v42 }
 0x23a   :  { %v523_v45 = vpop.xlane.xlu2 %522 }
 0x23b   :  { %v525_v46 = vsub.f32 %v517_v23, %v523_v45 }
 0x23d   :  { %v1554_v47 = vpop.eup %1553  ;;  %v528_v49 = vmul.f32 1.442695, %v525_v46 }
 0x23e   :  { %v530_v50 = vsel %vm331_vm2, %v1554_v47, 0.0 }
 0x23f   :  { %1555 = vpow2.f32 %v528_v49  ;;  %531 = vadd.xlane.f32.xlu2 %v530_v50  ;;  %v188_v49 = vadd.f32 %v1938_v28, %v1980_v7  ;;  %v190_v50 = vadd.f32 %v1938_v28, %v1982_v8  ;;  %v289_v28 = vpop.f32.mrf.mxu2 }
 0x240   :  { %1557 = vpow2.f32 %v342_v51  ;;  %v290_v8 = vadd.f32 %v1943_v31, %v289_v28 }
 0x241   :  { %v194_v51 = vpack.c.bf16 %v188_v49, %v188_v49 }
 0x242   :  { %v334_v52 = vpop.xlane.xlu2 %333  ;;  %v296_v4 = vpack.c.bf16 %v290_v8, %v290_v8 }
 0x243   :  { %v338_v53 = vsub.f32 %v329_v25, %v334_v52  ;;  %v379_v25 = vld [vmem:[#allocation7] sm:$0xf]  ;;  %v195_v52 = vpack.c.bf16 %v190_v50, %v190_v50 }
 0x244   :  { %v476_v26 = vsel %vm454_vm3, %v379_v25, 0 }
 0x245   :  { %v1556_v56 = vpop.eup %1555  ;;  %v340_v57 = vmul.f32 1.442695, %v338_v53  ;;  %485 = vmatpush.bf16.msra.mxu3 %v476_v26 }
 0x246   :  { %v536_v58 = vpack.c.bf16 %v1556_v56, %v1554_v47  ;;  %v533_v59 = vsel %vm331_vm2, %v1556_v56, 0.0  ;;  %v1558_v60 = vpop.eup %1557 }
 0x247   :  { %1559 = vpow2.f32 %v340_v57  ;;  %534 = vadd.xlane.f32.xlu2 %v533_v59  ;;  %v347_v63 = vsel %vm331_vm2, %v1558_v60, 0.0  ;;  %v291_v5 = vpop.f32.mrf.mxu2 }
 0x248   :  { %1460 = vmatmul.msk.bf16.vlgmr.msra.gmra.mxu1 %vm331_vm2, %v536_v58 }
 0x24d   :  { %v1560_v61 = vpop.eup %1559 }
 0x24e   :  { %v344_v62 = vsel %vm331_vm2, %v1560_v61, 0.0  ;;  %v350_v0 = vpack.c.bf16 %v1558_v60, %v1560_v61  ;;  %v680_v60 = vunpack.c.l.b16 %v194_v51  ;;  %v681_v61 = vunpack.c.l.b16 %v195_v52 }
 0x24f   :  { %345 = vadd.xlane.f32.xlu1 %v344_v62  ;;  %348 = vadd.xlane.f32.xlu2 %v347_v63 }
 0x250   :  { %1454 = vmatmul.msk.bf16.vlgmr.msrb.gmra.mxu3 %vm331_vm2, %v350_v0  ;;  %v2027_v7 = vpack.c.b16 %v681_v61, %v680_v60 }
 0x267   :  { %585 = vrot.lane.b32.xlu2 %v1960_v54, %s1767_s23  ;;  %v2010_v54 = vsel %vm454_vm3, %v562_v9, 0  ;;  %v731_v9 = vunpack.c.l.b16 %v296_v4 }
 0x268   :  { %587 = vrot.lane.b32.xlu1 %v1951_v43, %s1767_s23  ;;  %576 = vmatpush.bf16.msra.mxu2 %v2010_v54  ;;  %v230_v43 = vpop.f32.mrf.mxu1 }
 0x269   :  { %v231_v12 = vadd.f32 %v1918_v17, %v230_v43 }
 0x26b   :  { %v237_v16 = vpack.c.bf16 %v231_v12, %v231_v12 }
 0x26d   :  { %v685_v20 = vunpack.c.l.b16 %v237_v16 }
 0x26f   :  { %630 = vrot.lane.b32.xlu2 %v1962_v55, %s1767_s23 }
 0x270   :  { %v232_v11 = vpop.f32.mrf.mxu1 }
 0x271   :  { %v233_v13 = vadd.f32 %v1918_v17, %v232_v11 }
 0x273   :  { %v238_v18 = vpack.c.bf16 %v233_v13, %v233_v13 }
 0x275   :  { %v686_v23 = vunpack.c.l.b16 %v238_v18 }
 0x277   :  { %v2016_v32 = vpack.c.b16 %v686_v23, %v685_v20 }
 0x279   :  { %v692_v35 = vsel %vm308_vm1, %v2016_v32, 0 }
 0x2a2   :  { %v420_v10 = vpop.xlane.xlu2 %419 }
 0x2a3   :  { %1561 = vrcp.f32 %v420_v10 }
 0x2a9   :  { %v1562_v27 = vpop.eup %1561 }
 0x2aa   :  { %v423_v55 = vpop.xlane.xlu2 %422 }
 0x2ab   :  { %1563 = vrcp.f32 %v423_v55 }
 0x2b1   :  { %v1564_v29 = vpop.eup %1563 }
 0x2b2   :  { %v532_v14 = vpop.xlane.xlu2 %531 }
 0x2b3   :  { %1565 = vrcp.f32 %v532_v14 }
 0x2b5   :  { %v440_v15 = vpop.f32.mrf.mxu1 }
 0x2b6   :  { %v447_v33 = vmul.f32 %v1562_v27, %v440_v15 }
 0x2b9   :  { %v1566_v39 = vpop.eup %1565 }
 0x2ba   :  { %v535_v24 = vpop.xlane.xlu2 %534 }
 0x2bb   :  { %1567 = vrcp.f32 %v535_v24 }
 0x2bd   :  { %v442_v30 = vpop.f32.mrf.mxu1 }
 0x2be   :  { %v448_v17 = vmul.f32 %v1564_v29, %v442_v30 }
 0x2c0   :  { %v449_v34 = vpack.c.bf16 %v448_v17, %v447_v33 }
 0x2c1   :  { %v1568_v40 = vpop.eup %1567 }
 0x2c2   :  { %1457 = vmatmul.msk.bf16.vlgmr.msrb.gmra.mxu2 %vm308_vm1, %v449_v34  ;;  %v349_v36 = vpop.xlane.xlu2 %348  ;;  %v346_v46 = vpop.xlane.xlu1 %345 }
 0x2c3   :  { %701 = vmatpush.bf16.xpose.msrb.mxu2 %v692_v35  ;;  %1569 = vrcp.f32 %v346_v46 }
 0x2c4   :  { %1571 = vrcp.f32 %v349_v36 }
 0x2c5   :  { %v552_v37 = vpop.f32.mrf.mxu1 }
 0x2c6   :  { %v559_v42 = vmul.f32 %v1566_v39, %v552_v37 }
 0x2c9   :  { %v1570_v53 = vpop.eup %1569 }
 0x2ca   :  { %v586_v38 = vpop.permute.xlu2 %585  ;;  %v1572_v57 = vpop.eup %1571 }
 0x2cd   :  { %v554_v41 = vpop.f32.mrf.mxu1 }
 0x2ce   :  { %v560_v44 = vmul.f32 %v1568_v40, %v554_v41 }
 0x2d0   :  { %v561_v45 = vpack.c.bf16 %v560_v44, %v559_v42 }
 0x2d2   :  { %1461 = vmatmul.msk.bf16.vlgmr.msra.gmra.mxu2 %vm308_vm1, %v561_v45  ;;  %v631_v47 = vpop.permute.xlu2 %630 }
 0x2d3   :  { %v369_v48 = vpop.f32.mrf.mxu3  ;;  %643 = vmatpush.bf16.msrb.mxu0 %v631_v47  ;;  %837 = vmatpush.bf16.msra.mxu2 %v456_v6  ;;  %v292_v6 = vadd.f32 %v1943_v31, %v291_v5 }
 0x2d4   :  { %v376_v62 = vmul.f32 %v1570_v53, %v369_v48 }
 0x2d5   :  { %v297_v10 = vpack.c.bf16 %v292_v6, %v292_v6 }
 0x2d7   :  { %v732_v43 = vunpack.c.l.b16 %v297_v10 }
 0x2d9   :  { %v2036_v55 = vpack.c.b16 %v732_v43, %v731_v9 }
 0x2da   :  { %v588_v56 = vpop.permute.xlu1 %587 }
 0x2db   :  { %v593_v58 = vsel %vm308_vm1, %v588_v56, 0  ;;  %v371_v59 = vpop.f32.mrf.mxu3 }
 0x2dc   :  { %v377_v63 = vmul.f32 %v1572_v57, %v371_v59  ;;  %602 = vmatpush.bf16.xpose.msrb.mxu3 %v593_v58 }
 0x2de   :  { %v378_v0 = vpack.c.bf16 %v377_v63, %v376_v62 }
 0x2e0   :  { %1458 = vmatmul.msk.bf16.vlgmr.msra.gmra.mxu3 %vm308_vm1, %v378_v0 }
 0x2e2   :  { %1465 = vmatmul.msk.bf16.vlgmr.msrb.gmra.mxu2 %vm308_vm1, %v2027_v7 }
 0x2e3   :  { %941 = vmatpush.bf16.msrb.mxu2 %v2010_v54 }
 0x2e4   :  { %745 = vmatpush.bf16.msra.mxu3 %v2036_v55 }
 0x2f0   :  { %1462 = vmatmul.msk.bf16.vlgmr.msrb.gmra.mxu3 %vm308_vm1, %v586_v38 }
 0x2f1   :  { %854 = vmatpush.bf16.msrb.mxu3 %v476_v26 }
 0x345   :  { %v467_v11 = vpop.f32.mrf.mxu2 }
 0x34d   :  { %v469_v12 = vpop.f32.mrf.mxu2 }
 0x355   :  { %v578_v54 = vpop.f32.mrf.mxu2 }
 0x35d   :  { %v580_v13 = vpop.f32.mrf.mxu2 }
 0x363   :  { %v487_v14 = vpop.f32.mrf.mxu3 }
 0x364   :  { %v488_v15 = vadd.f32 %v487_v14, %v467_v11 }
 0x365   :  { %v703_v16 = vpop.f32.mrf.mxu2 }
 0x366   :  { %v708_v18 = vmul.f32 0.35355338, %v703_v16  ;;  %v2039_v20 = vadd.f32 %v578_v54, %v488_v15  ;;  %v655_v15 = vld [vmem:[#allocation7 + $0xc] sm:$0xf] }
 0x367   :  { %v2074_v16 = vsel %vm454_vm3, %v655_v15, 0 }
 0x368   :  { %v710_v31 = vsel %vm331_vm2, %v708_v18, -inf  ;;  %669 = vmatpush.bf16.msrb.mxu1 %v2074_v16 }
 0x369   :  { %711 = vmax.xlane.f32.xlu0 %v710_v31 }
 0x36b   :  { %v489_v23 = vpop.f32.mrf.mxu3 }
 0x36c   :  { %v490_v24 = vadd.f32 %v489_v23, %v469_v12 }
 0x36d   :  { %v705_v25 = vpop.f32.mrf.mxu2 }
 0x36e   :  { %v709_v27 = vmul.f32 0.35355338, %v705_v25  ;;  %v2042_v29 = vadd.f32 %v580_v13, %v490_v24 }
 0x370   :  { %v713_v26 = vsel %vm331_vm2, %v709_v27, -inf }
 0x371   :  { %714 = vmax.xlane.f32.xlu0 %v713_v26 }
 0x373   :  { %v604_v30 = vpop.f32.mrf.mxu3 }
 0x374   :  { %v609_v33 = vmul.f32 0.35355338, %v604_v30 }
 0x376   :  { %v611_v17 = vsel %vm331_vm2, %v609_v33, -inf }
 0x379   :  { %612 = vmax.xlane.f32.xlu0 %v611_v17 }
 0x37b   :  { %v606_v34 = vpop.f32.mrf.mxu3 }
 0x37c   :  { %v610_v35 = vmul.f32 0.35355338, %v606_v34 }
 0x37e   :  { %v614_v36 = vsel %vm331_vm2, %v610_v35, -inf }
 0x37f   :  { %615 = vmax.xlane.f32.xlu1 %v614_v36 }
 0x38d   :  { %759 = vrot.lane.b32.xlu0 %v2016_v32, %s1766_s7 }
 0x395   :  { %757 = vrot.lane.b32.xlu0 %v2027_v7, %s1766_s7 }
 0x398   :  { %863 = vrot.lane.b32.xlu1 %v2016_v32, %s1765_s3 }
 0x39d   :  { %952 = vrot.lane.b32.xlu0 %v2016_v32, %s1767_s23 }
 0x3dc   :  { %v712_v37 = vpop.xlane.xlu0 %711 }
 0x3dd   :  { %v716_v38 = vsub.f32 %v708_v18, %v712_v37 }
 0x3df   :  { %v718_v39 = vmul.f32 1.442695, %v716_v38 }
 0x3e1   :  { %1573 = vpow2.f32 %v718_v39 }
 0x3e4   :  { %v715_v40 = vpop.xlane.xlu0 %714 }
 0x3e5   :  { %v717_v41 = vsub.f32 %v709_v27, %v715_v40 }
 0x3e7   :  { %v1574_v42 = vpop.eup %1573  ;;  %v720_v44 = vmul.f32 1.442695, %v717_v41 }
 0x3e8   :  { %v722_v45 = vsel %vm331_vm2, %v1574_v42, 0.0 }
 0x3e9   :  { %1575 = vpow2.f32 %v720_v44  ;;  %723 = vadd.xlane.f32.xlu0 %v722_v45 }
 0x3ec   :  { %v613_v46 = vpop.xlane.xlu0 %612 }
 0x3ed   :  { %v617_v47 = vsub.f32 %v609_v33, %v613_v46 }
 0x3ef   :  { %v1576_v48 = vpop.eup %1575  ;;  %v619_v32 = vmul.f32 1.442695, %v617_v47 }
 0x3f0   :  { %v728_v49 = vpack.c.bf16 %v1576_v48, %v1574_v42  ;;  %v725_v50 = vsel %vm331_vm2, %v1576_v48, 0.0 }
 0x3f1   :  { %726 = vadd.xlane.f32.xlu2 %v725_v50  ;;  %1577 = vpow2.f32 %v619_v32 }
 0x3f2   :  { %v616_v51 = vpop.xlane.xlu1 %615  ;;  %1466 = vmatmul.msk.bf16.vlgmr.msra.gmra.mxu3 %vm331_vm2, %v728_v49 }
 0x3f3   :  { %v618_v52 = vsub.f32 %v610_v35, %v616_v51 }
 0x3f5   :  { %v621_v53 = vmul.f32 1.442695, %v618_v52 }
 0x3f7   :  { %1579 = vpow2.f32 %v621_v53  ;;  %v1578_v56 = vpop.eup %1577 }
 0x3f8   :  { %v623_v4 = vsel %vm331_vm2, %v1578_v56, 0.0 }
 0x3fd   :  { %v1580_v57 = vpop.eup %1579  ;;  %861 = vrot.lane.b32.xlu0 %v2027_v7, %s1765_s3 }
 0x3fe   :  { %v629_v58 = vpack.c.bf16 %v1580_v57, %v1578_v56  ;;  %v626_v59 = vsel %vm331_vm2, %v1580_v57, 0.0 }
 0x3ff   :  { %627 = vadd.xlane.f32.xlu1 %v626_v59  ;;  %v760_v60 = vpop.permute.xlu0 %759 }
 0x400   :  { %v765_v61 = vsel %vm308_vm1, %v760_v60, 0  ;;  %1463 = vmatmul.msk.bf16.vlgmr.msrb.gmra.mxu0 %vm331_vm2, %v629_v58 }
 0x401   :  { %774 = vmatpush.bf16.xpose.msra.mxu0 %v765_v61 }
 0x407   :  { %v758_v62 = vpop.permute.xlu0 %757 }
 0x409   :  { %950 = vrot.lane.b32.xlu2 %v2027_v7, %s1767_s23 }
 0x40a   :  { %v864_v63 = vpop.permute.xlu1 %863 }
 0x40b   :  { %v869_v0 = vsel %vm308_vm1, %v864_v63, 0 }
 0x40c   :  { %878 = vmatpush.bf16.xpose.msrb.mxu0 %v869_v0 }
 0x40f   :  { %v953_v28 = vpop.permute.xlu0 %952 }
 0x410   :  { %v958_v8 = vsel %vm308_vm1, %v953_v28, 0  ;;  %1467 = vmatmul.msk.bf16.vlgmr.msra.gmra.mxu0 %vm308_vm1, %v758_v62 }
 0x411   :  { %967 = vmatpush.bf16.xpose.msra.mxu3 %v958_v8 }
 0x427   :  { %624 = vadd.xlane.f32.xlu0 %v623_v4 }
 0x43b   :  { %802 = vrot.lane.b32.xlu0 %v2036_v55, %s1766_s7 }
 0x45c   :  { %v724_v5 = vpop.xlane.xlu0 %723 }
 0x45d   :  { %1581 = vrcp.f32 %v724_v5 }
 0x463   :  { %v1582_v10 = vpop.eup %1581 }
 0x464   :  { %v727_v7 = vpop.xlane.xlu2 %726 }
 0x465   :  { %1583 = vrcp.f32 %v727_v7 }
 0x46b   :  { %v1584_v43 = vpop.eup %1583 }
 0x46c   :  { %v951_v25 = vpop.permute.xlu2 %950 }
 0x46f   :  { %v862_v6 = vpop.permute.xlu0 %861 }
 0x470   :  { %1471 = vmatmul.msk.bf16.vlgmr.msrb.gmra.mxu0 %vm308_vm1, %v862_v6 }
 0x472   :  { %v628_v30 = vpop.xlane.xlu1 %627 }
 0x473   :  { %1585 = vrcp.f32 %v628_v30 }
 0x475   :  { %v747_v9 = vpop.f32.mrf.mxu3 }
 0x476   :  { %v754_v54 = vmul.f32 %v1582_v10, %v747_v9 }
 0x479   :  { %v1586_v34 = vpop.eup %1585 }
 0x47d   :  { %v645_v11 = vpop.f32.mrf.mxu0  ;;  %v749_v12 = vpop.f32.mrf.mxu3 }
 0x47e   :  { %v755_v13 = vmul.f32 %v1584_v43, %v749_v12 }
 0x480   :  { %v756_v14 = vpack.c.bf16 %v755_v13, %v754_v54 }
 0x482   :  { %1470 = vmatmul.msk.bf16.vlgmr.msrb.gmra.mxu3 %vm308_vm1, %v756_v14 }
 0x485   :  { %v647_v18 = vpop.f32.mrf.mxu0 }
 0x486   :  { %v653_v36 = vmul.f32 %v1586_v34, %v647_v18 }
 0x48d   :  { %v776_v31 = vpop.f32.mrf.mxu0 }
 0x48e   :  { %v781_v23 = vmul.f32 0.35355338, %v776_v31 }
 0x490   :  { %v783_v24 = vsel %vm331_vm2, %v781_v23, -inf }
 0x491   :  { %784 = vmax.xlane.f32.xlu2 %v783_v24 }
 0x492   :  { %1474 = vmatmul.msk.bf16.vlgmr.msra.gmra.mxu3 %vm308_vm1, %v951_v25 }
 0x495   :  { %v778_v27 = vpop.f32.mrf.mxu0 }
 0x496   :  { %v782_v26 = vmul.f32 0.35355338, %v778_v27 }
 0x498   :  { %v786_v33 = vsel %vm331_vm2, %v782_v26, -inf }
 0x499   :  { %787 = vmax.xlane.f32.xlu0 %v786_v33 }
 0x49a   :  { %v625_v17 = vpop.xlane.xlu0 %624 }
 0x49b   :  { %1587 = vrcp.f32 %v625_v17 }
 0x4a1   :  { %v1588_v35 = vpop.eup %1587 }
 0x4a2   :  { %v652_v37 = vmul.f32 %v1588_v35, %v645_v11 }
 0x4a4   :  { %v654_v38 = vpack.c.bf16 %v653_v36, %v652_v37  ;;  %v2105_v36 = vld [vmem:[%s2240_s9] ss:$0 sm:$0xff] }
 0x4a6   :  { %1464 = vmatmul.msk.bf16.vlgmr.msrb.gmra.mxu1 %vm308_vm1, %v654_v38 }
 0x4ad   :  { %995 = vrot.lane.b32.xlu0 %v2036_v55, %s1767_s23  ;;  %v803_v39 = vpop.permute.xlu0 %802 }
 0x4ae   :  { %815 = vmatpush.bf16.msra.mxu1 %v803_v39 }
 0x4ed   :  { %v880_v40 = vpop.f32.mrf.mxu0 }
 0x4ee   :  { %v885_v41 = vmul.f32 0.35355338, %v880_v40 }
 0x4f0   :  { %v887_v42 = vsel %vm331_vm2, %v885_v41, -inf }
 0x4f1   :  { %888 = vmax.xlane.f32.xlu1 %v887_v42 }
 0x4f5   :  { %v882_v44 = vpop.f32.mrf.mxu0 }
 0x4f6   :  { %v886_v45 = vmul.f32 0.35355338, %v882_v44 }
 0x4f8   :  { %v890_v46 = vsel %vm331_vm2, %v886_v45, -inf }
 0x4f9   :  { %891 = vmax.xlane.f32.xlu1 %v890_v46 }
 0x504   :  { %v785_v47 = vpop.xlane.xlu2 %784 }
 0x505   :  { %v2085_v48 = vpop.f32.mrf.mxu3  ;;  %v789_v49 = vsub.f32 %v781_v23, %v785_v47 }
 0x507   :  { %v791_v50 = vmul.f32 1.442695, %v789_v49 }
 0x509   :  { %1589 = vpow2.f32 %v791_v50 }
 0x50c   :  { %v788_v32 = vpop.xlane.xlu0 %787 }
 0x50d   :  { %v790_v51 = vsub.f32 %v782_v26, %v788_v32  ;;  %v2087_v52 = vpop.f32.mrf.mxu3 }
 0x50f   :  { %v793_v53 = vmul.f32 1.442695, %v790_v51  ;;  %v1590_v57 = vpop.eup %1589 }
 0x510   :  { %v795_v4 = vsel %vm331_vm2, %v1590_v57, 0.0 }
 0x511   :  { %1591 = vpow2.f32 %v793_v53 }
 0x515   :  { %v969_v56 = vpop.f32.mrf.mxu3 }
 0x516   :  { %v974_v58 = vmul.f32 0.35355338, %v969_v56 }
 0x517   :  { %v1592_v59 = vpop.eup %1591 }
 0x518   :  { %v801_v60 = vpack.c.bf16 %v1592_v59, %v1590_v57  ;;  %v976_v61 = vsel %vm331_vm2, %v974_v58, -inf  ;;  %v798_v62 = vsel %vm331_vm2, %v1592_v59, 0.0 }
 0x519   :  { %977 = vmax.xlane.f32.xlu2 %v976_v61  ;;  %799 = vadd.xlane.f32.xlu0 %v798_v62 }
 0x51a   :  { %1468 = vmatmul.msk.bf16.vlgmr.msra.gmra.mxu1 %vm331_vm2, %v801_v60 }
 0x51d   :  { %v971_v63 = vpop.f32.mrf.mxu3 }
 0x51e   :  { %v975_v0 = vmul.f32 0.35355338, %v971_v63 }
 0x51f   :  { %v996_v28 = vpop.permute.xlu0 %995 }
 0x520   :  { %1008 = vmatpush.bf16.msra.mxu0 %v996_v28  ;;  %v979_v8 = vsel %vm331_vm2, %v975_v0, -inf }
 0x521   :  { %980 = vmax.xlane.f32.xlu1 %v979_v8 }
 0x523   :  { %v671_v14 = vpop.f32.mrf.mxu1 }
 0x524   :  { %v676_v35 = vadd.f32 %v671_v14, %v2039_v20 }
 0x526   :  { %v1043_v38 = vadd.f32 %v2105_v36, %v676_v35 }
 0x528   :  { %v1047_v47 = vadd.f32 %v1043_v38, %v128_v2 }
 0x529   :  { %796 = vadd.xlane.f32.xlu1 %v795_v4 }
 0x52a   :  { %v1053_v32 = vsel %vm166_vm0, %v1047_v47, 0.0 }
 0x531   :  { %906 = vrot.lane.b32.xlu2 %v2036_v55, %s1765_s3  ;;  %v673_v55 = vpop.f32.mrf.mxu1 }
 0x532   :  { %v677_v44 = vadd.f32 %v673_v55, %v2042_v29 }
 0x534   :  { %v1044_v50 = vadd.f32 %v2105_v36, %v677_v44 }
 0x536   :  { %v1048_v51 = vadd.f32 %v1044_v50, %v129_v3 }
 0x538   :  { %v1056_v53 = vsel %vm166_vm0, %v1048_v51, 0.0 }
 0x564   :  { %v889_v5 = vpop.xlane.xlu1 %888 }
 0x565   :  { %v893_v6 = vsub.f32 %v885_v41, %v889_v5 }
 0x567   :  { %v895_v7 = vmul.f32 1.442695, %v893_v6 }
 0x569   :  { %1593 = vpow2.f32 %v895_v7  ;;  %v1768_v7 = vmov 32.0  }
 0x56c   :  { %v892_v9 = vpop.xlane.xlu1 %891 }
 0x56d   :  { %v894_v10 = vsub.f32 %v886_v45, %v892_v9 }
 0x56f   :  { %v1594_v43 = vpop.eup %1593  ;;  %v897_v11 = vmul.f32 1.442695, %v894_v10 }
 0x570   :  { %v899_v12 = vsel %vm331_vm2, %v1594_v43, 0.0 }
 0x571   :  { %1595 = vpow2.f32 %v897_v11  ;;  %900 = vadd.xlane.f32.xlu1 %v899_v12 }
 0x577   :  { %v1596_v54 = vpop.eup %1595 }
 0x578   :  { %v902_v13 = vsel %vm331_vm2, %v1596_v54, 0.0  ;;  %v905_v27 = vpack.c.bf16 %v1596_v54, %v1594_v43 }
 0x579   :  { %903 = vadd.xlane.f32.xlu1 %v902_v13 }
 0x58c   :  { %v978_v15 = vpop.xlane.xlu2 %977  ;;  %v800_v34 = vpop.xlane.xlu0 %799 }
 0x58d   :  { %v982_v18 = vsub.f32 %v974_v58, %v978_v15 }
 0x58f   :  { %v984_v31 = vmul.f32 1.442695, %v982_v18 }
 0x591   :  { %1597 = vpow2.f32 %v984_v31 }
 0x594   :  { %v907_v23 = vpop.permute.xlu2 %906  ;;  %v981_v24 = vpop.xlane.xlu1 %980 }
 0x595   :  { %v983_v25 = vsub.f32 %v975_v0, %v981_v24  ;;  %919 = vmatpush.bf16.msrb.mxu1 %v907_v23 }
 0x597   :  { %v1598_v26 = vpop.eup %1597  ;;  %v986_v30 = vmul.f32 1.442695, %v983_v25  ;;  %v817_v33 = vpop.f32.mrf.mxu1 }
 0x598   :  { %1472 = vmatmul.msk.bf16.vlgmr.msrb.gmra.mxu1 %vm331_vm2, %v905_v27  ;;  %v988_v17 = vsel %vm331_vm2, %v1598_v26, 0.0 }
 0x599   :  { %1030 = vmatpush.bf16.msra.mxu1 %v2074_v16  ;;  %1599 = vpow2.f32 %v986_v30  ;;  %989 = vadd.xlane.f32.xlu2 %v988_v17 }
 0x59a   :  { %1601 = vrcp.f32 %v800_v34 }
 0x59c   :  { %v797_v37 = vpop.xlane.xlu1 %796 }
 0x59d   :  { %1603 = vrcp.f32 %v797_v37 }
 0x59f   :  { %v1600_v16 = vpop.eup %1599  ;;  %v819_v41 = vpop.f32.mrf.mxu1 }
 0x5a0   :  { %v994_v39 = vpack.c.bf16 %v1600_v16, %v1598_v26  ;;  %v991_v40 = vsel %vm331_vm2, %v1600_v16, 0.0  ;;  %v1602_v42 = vpop.eup %1601 }
 0x5a1   :  { %992 = vadd.xlane.f32.xlu1 %v991_v40  ;;  %v825_v46 = vmul.f32 %v1602_v42, %v819_v41 }
 0x5a2   :  { %1475 = vmatmul.msk.bf16.vlgmr.msra.gmra.mxu0 %vm331_vm2, %v994_v39  ;;  %vm1251_vm2 = vcmask 523264  }
 0x5a3   :  { %v1604_v20 = vpop.eup %1603 }
 0x5a4   :  { %v824_v45 = vmul.f32 %v1604_v20, %v817_v33 }
 0x5a6   :  { %v826_v49 = vpack.c.bf16 %v825_v46, %v824_v45 }
 0x5a8   :  { %1469 = vmatmul.msk.bf16.vlgmr.msra.gmra.mxu2 %vm308_vm1, %v826_v49 }
 0x5a9   :  { %1054 = vadd.xlane.f32.xlu1 %v1053_v32 }
 0x5b1   :  { %1057 = vadd.xlane.f32.xlu1 %v1056_v53 }
 0x5e4   :  { %v901_v29 = vpop.xlane.xlu1 %900 }
 0x5e5   :  { %1605 = vrcp.f32 %v901_v29 }
 0x5eb   :  { %v1606_v2 = vpop.eup %1605 }
 0x5ec   :  { %v904_v56 = vpop.xlane.xlu1 %903 }
 0x5ed   :  { %1607 = vrcp.f32 %v904_v56  ;;  %v1513_v56 = vld [vmem:[#allocation8] sm:$0xff] }
 0x5f3   :  { %v1608_v58 = vpop.eup %1607 }
 0x60c   :  { %v990_v59 = vpop.xlane.xlu2 %989 }
 0x60d   :  { %1609 = vrcp.f32 %v990_v59 }
 0x613   :  { %v1610_v1 = vpop.eup %1609 }
 0x614   :  { %v993_v61 = vpop.xlane.xlu1 %992 }
 0x615   :  { %v921_v57 = vpop.f32.mrf.mxu1  ;;  %1611 = vrcp.f32 %v993_v61 }
 0x616   :  { %v928_v62 = vmul.f32 %v1606_v2, %v921_v57  ;;  %1613 = vrcp.f32 %v1768_v7 }
 0x61b   :  { %v1612_v3 = vpop.eup %1611 }
 0x61c   :  { %v1614_v10 = vpop.eup %1613  ;;  %v1055_v18 = vpop.xlane.xlu1 %1054 }
 0x61d   :  { %v923_v60 = vpop.f32.mrf.mxu1  ;;  %v1066_v43 = vmul.f32 32.0, %v1614_v10  ;;  %vm1070_vm4 = vweird.f32 %v1614_v10 }
 0x61e   :  { %v929_v63 = vmul.f32 %v1608_v58, %v923_v60 }
 0x61f   :  { %v1010_v0 = vpop.f32.mrf.mxu0  ;;  %v1067_v11 = vsub.f32 1.0, %v1066_v43 }
 0x620   :  { %v930_v28 = vpack.c.bf16 %v929_v63, %v928_v62  ;;  %v1017_v4 = vmul.f32 %v1610_v1, %v1010_v0 }
 0x621   :  { %v1068_v54 = vmul.f32 %v1614_v10, %v1067_v11 }
 0x622   :  { %1473 = vmatmul.msk.bf16.vlgmr.msrb.gmra.mxu2 %vm308_vm1, %v930_v28 }
 0x623   :  { %v1069_v13 = vadd.f32 %v1614_v10, %v1068_v54 }
 0x624   :  { %v1058_v35 = vpop.xlane.xlu1 %1057 }
 0x625   :  { %v2122_v31 = vsel %vm1070_vm4, %v1614_v10, %v1069_v13 }
 0x626   :  { %v1072_v25 = vmul.f32 %v2122_v31, %v1055_v18  ;;  %v1073_v38 = vmul.f32 %v2122_v31, %v1058_v35 }
 0x627   :  { %v1012_v8 = vpop.f32.mrf.mxu0 }
 0x628   :  { %v1018_v5 = vmul.f32 %v1612_v3, %v1012_v8  ;;  %v1076_v17 = vsub.f32 %v1047_v47, %v1072_v25 }
 0x62a   :  { %v1019_v6 = vpack.c.bf16 %v1018_v5, %v1017_v4  ;;  %v1080_v40 = vmul.f32 %v1076_v17, %v1076_v17 }
 0x62b   :  { %v839_v9 = vpop.f32.mrf.mxu2 }
 0x62c   :  { %1476 = vmatmul.msk.bf16.vlgmr.msra.gmra.mxu1 %vm308_vm1, %v1019_v6  ;;  %v857_v15 = vadd.f32 %v2085_v48, %v839_v9  ;;  %v1084_v42 = vsel %vm166_vm0, %v1080_v40, 0.0  ;;  %v1543_v9 = vld [vmem:[%s2241_s10] ss:$0 sm:$0xff]  ;;  %v1518_v40 = vld [vmem:[%s2245_s14 + $0x18] sm:$0xff] }
 0x62d   :  { %1262 = vmatpush.bf16.msrb.mxu3 %v1518_v40 }
 0x633   :  { %v841_v12 = vpop.f32.mrf.mxu2 }
 0x634   :  { %v859_v30 = vadd.f32 %v2087_v52, %v841_v12  ;;  %v1077_v52 = vsub.f32 %v1048_v51, %v1073_v38  ;;  %v1544_v12 = vld [vmem:[%s2242_s11] ss:$0 sm:$0xff] }
 0x636   :  { %v1081_v20 = vmul.f32 %v1077_v52, %v1077_v52 }
 0x638   :  { %v1087_v44 = vsel %vm166_vm0, %v1081_v20, 0.0 }
 0x6a5   :  { %v943_v14 = vpop.f32.mrf.mxu2 }
 0x6a6   :  { %v948_v55 = vadd.f32 %v943_v14, %v857_v15 }
 0x6a9   :  { %v1032_v23 = vpop.f32.mrf.mxu1 }
 0x6aa   :  { %v1037_v24 = vadd.f32 %v1032_v23, %v948_v55 }
 0x6ac   :  { %v1045_v27 = vadd.f32 %v2105_v36, %v1037_v24 }
 0x6ad   :  { %v945_v26 = vpop.f32.mrf.mxu2 }
 0x6ae   :  { %v1049_v33 = vadd.f32 %v1045_v27, %v130_v21  ;;  %v949_v34 = vadd.f32 %v945_v26, %v859_v30 }
 0x6b0   :  { %v1059_v48 = vsel %vm166_vm0, %v1049_v33, 0.0 }
 0x6b1   :  { %v1034_v37 = vpop.f32.mrf.mxu1  ;;  %1060 = vadd.xlane.f32.xlu0 %v1059_v48 }
 0x6b2   :  { %v1038_v16 = vadd.f32 %v1034_v37, %v949_v34 }
 0x6b4   :  { %v1046_v39 = vadd.f32 %v2105_v36, %v1038_v16  ;;  %v1514_v36 = vld [vmem:[#allocation8 + $0x8] sm:$0xff] }
 0x6b5   :  { %1196 = vmatpush.bf16.msra.mxu2 %v1514_v36 }
 0x6b6   :  { %v1050_v41 = vadd.f32 %v1046_v39, %v131_v22 }
 0x6b8   :  { %v1062_v21 = vsel %vm166_vm0, %v1050_v41, 0.0 }
 0x6b9   :  { %1085 = vadd.xlane.f32.xlu0 %v1084_v42  ;;  %1063 = vadd.xlane.f32.xlu1 %v1062_v21  ;;  %v1517_v21 = vld [vmem:[%s2245_s14 + $0x10] sm:$0xff] }
 0x6ba   :  { %1197 = vmatpush.bf16.msra.mxu2 %v1513_v56  ;;  %1263 = vmatpush.bf16.msrb.mxu3 %v1517_v21 }
 0x6c1   :  { %1088 = vadd.xlane.f32.xlu1 %v1087_v44 }
 0x724   :  { %v1061_v45 = vpop.xlane.xlu0 %1060 }
 0x725   :  { %v1074_v46 = vmul.f32 %v2122_v31, %v1061_v45 }
 0x727   :  { %v2138_v47 = vsub.f32 %v1049_v33, %v1074_v46  ;;  %v1516_v46 = vld [vmem:[%s2245_s14 + $0x8] sm:$0xff] }
 0x728   :  { %1264 = vmatpush.bf16.msrb.mxu3 %v1516_v46 }
 0x729   :  { %v1082_v19 = vmul.f32 %v2138_v47, %v2138_v47 }
 0x72b   :  { %v1090_v22 = vsel %vm166_vm0, %v1082_v19, 0.0 }
 0x72c   :  { %1091 = vadd.xlane.f32.xlu2 %v1090_v22  ;;  %v1086_v49 = vpop.xlane.xlu0 %1085  ;;  %v1064_v50 = vpop.xlane.xlu1 %1063 }
 0x72d   :  { %v1096_v32 = vmul.f32 %v1086_v49, %v2122_v31  ;;  %v1075_v51 = vmul.f32 %v2122_v31, %v1064_v50  ;;  %v1515_v49 = vld [vmem:[%s2245_s14] sm:$0xff] }
 0x72e   :  { %1265 = vmatpush.bf16.msrb.mxu3 %v1515_v49 }
 0x72f   :  { %v1100_v53 = vadd.f32 1e-05, %v1096_v32  ;;  %v2145_v29 = vsub.f32 %v1050_v41, %v1075_v51 }
 0x731   :  { %1615 = vrsqrt.f32 %v1100_v53  ;;  %v1083_v57 = vmul.f32 %v2145_v29, %v2145_v29  ;;  %vm1110_vm6 = vweird.f32 %v1100_v53 }
 0x733   :  { %v1093_v2 = vsel %vm166_vm0, %v1083_v57, 0.0 }
 0x734   :  { %1094 = vadd.xlane.f32.xlu0 %v1093_v2  ;;  %v1089_v58 = vpop.xlane.xlu1 %1088 }
 0x735   :  { %v1097_v59 = vmul.f32 %v1089_v58, %v2122_v31 }
 0x737   :  { %v1616_v60 = vpop.eup %1615  ;;  %v1101_v61 = vadd.f32 1e-05, %v1097_v59 }
 0x738   :  { %v1105_v62 = vmul.f32 %v1616_v60, %v1100_v53  ;;  %vm1111_vm5 = vweird.f32 %v1616_v60  ;;  %v1545_v53 = vld [vmem:[%s2244_s13] ss:$0 sm:$0xff] }
 0x739   :  { %1617 = vrsqrt.f32 %v1101_v61  ;;  %vm1112_vm7 = vmor %vm1110_vm6, %vm1111_vm5  ;;  %vm1120_vm9 = vweird.f32 %v1101_v61 }
 0x73a   :  { %v1106_v63 = vmul.f32 %v1616_v60, %v1105_v62 }
 0x73c   :  { %v1107_v0 = vmul.f32 0.5, %v1106_v63 }
 0x73e   :  { %v1108_v28 = vsub.f32 1.5, %v1107_v0 }
 0x73f   :  { %v1618_v1 = vpop.eup %1617 }
 0x740   :  { %v1109_v3 = vmul.f32 %v1616_v60, %v1108_v28  ;;  %v1115_v8 = vmul.f32 %v1618_v1, %v1101_v61  ;;  %vm1121_vm8 = vweird.f32 %v1618_v1 }
 0x741   :  { %vm1122_vm10 = vmor %vm1120_vm9, %vm1121_vm8 }
 0x742   :  { %v1116_v4 = vmul.f32 %v1618_v1, %v1115_v8  ;;  %v1113_v5 = vsel %vm1112_vm7, %v1616_v60, %v1109_v3  ;;  %v1546_v3 = vld [vmem:[%s2246_s15] ss:$0 sm:$0xff]  ;;  %vm1389_vm7 = vcmask 257024  }
 0x743   :  { %v1144_v10 = vmul.f32 %v1113_v5, %v1076_v17 }
 0x744   :  { %v1117_v6 = vmul.f32 0.5, %v1116_v4 }
 0x745   :  { %v1151_v54 = vmul.f32 %v1543_v9, %v1144_v10 }
 0x746   :  { %v1118_v7 = vsub.f32 1.5, %v1117_v6 }
 0x747   :  { %v2157_v15 = vadd.f32 %v1544_v12, %v1151_v54 }
 0x748   :  { %v1119_v43 = vmul.f32 %v1618_v1, %v1118_v7 }
 0x74a   :  { %v1123_v11 = vsel %vm1122_vm10, %v1618_v1, %v1119_v43 }
 0x74b   :  { %v1145_v13 = vmul.f32 %v1123_v11, %v1077_v52 }
 0x74d   :  { %v1152_v14 = vmul.f32 %v1543_v9, %v1145_v13 }
 0x74f   :  { %v2159_v18 = vadd.f32 %v1544_v12, %v1152_v14 }
 0x751   :  { %v1162_v55 = vpack.c.bf16 %v2159_v18, %v2157_v15 }
 0x753   :  { %1485 = vmatmul.msk.bf16.vlgmr.msra.gmra.mxu2 %vm166_vm0, %v1162_v55 }
 0x79f   :  { %v1092_v23 = vpop.xlane.xlu2 %1091 }
 0x7a0   :  { %v1098_v24 = vmul.f32 %v1092_v23, %v2122_v31 }
 0x7a2   :  { %v1102_v25 = vadd.f32 1e-05, %v1098_v24 }
 0x7a4   :  { %1619 = vrsqrt.f32 %v1102_v25  ;;  %vm1130_vm12 = vweird.f32 %v1102_v25 }
 0x7a7   :  { %v1095_v27 = vpop.xlane.xlu0 %1094 }
 0x7a8   :  { %v1099_v26 = vmul.f32 %v1095_v27, %v2122_v31 }
 0x7aa   :  { %v1620_v30 = vpop.eup %1619  ;;  %v1103_v33 = vadd.f32 1e-05, %v1099_v26 }
 0x7ab   :  { %v1125_v17 = vmul.f32 %v1620_v30, %v1102_v25  ;;  %vm1131_vm11 = vweird.f32 %v1620_v30 }
 0x7ac   :  { %1621 = vrsqrt.f32 %v1103_v33  ;;  %vm1132_vm13 = vmor %vm1130_vm12, %vm1131_vm11  ;;  %vm1140_vm15 = vweird.f32 %v1103_v33 }
 0x7ad   :  { %v1126_v34 = vmul.f32 %v1620_v30, %v1125_v17 }
 0x7af   :  { %v1127_v48 = vmul.f32 0.5, %v1126_v34 }
 0x7b1   :  { %v1128_v35 = vsub.f32 1.5, %v1127_v48 }
 0x7b2   :  { %v1622_v37 = vpop.eup %1621 }
 0x7b3   :  { %v1129_v16 = vmul.f32 %v1620_v30, %v1128_v35  ;;  %v1135_v38 = vmul.f32 %v1622_v37, %v1103_v33  ;;  %vm1141_vm14 = vweird.f32 %v1622_v37 }
 0x7b4   :  { %vm1142_vm1 = vmor %vm1140_vm15, %vm1141_vm14 }
 0x7b5   :  { %v1136_v39 = vmul.f32 %v1622_v37, %v1135_v38  ;;  %v1133_v41 = vsel %vm1132_vm13, %v1620_v30, %v1129_v16 }
 0x7b6   :  { %v1146_v20 = vmul.f32 %v1133_v41, %v2138_v47 }
 0x7b7   :  { %v1137_v52 = vmul.f32 0.5, %v1136_v39 }
 0x7b8   :  { %v1153_v22 = vmul.f32 %v1543_v9, %v1146_v20 }
 0x7b9   :  { %v1138_v42 = vsub.f32 1.5, %v1137_v52 }
 0x7ba   :  { %v1160_v50 = vadd.f32 %v1544_v12, %v1153_v22 }
 0x7bb   :  { %v1139_v44 = vmul.f32 %v1622_v37, %v1138_v42 }
 0x7bd   :  { %v1143_v45 = vsel %vm1142_vm1, %v1622_v37, %v1139_v44 }
 0x7be   :  { %v1147_v19 = vmul.f32 %v1143_v45, %v2145_v29 }
 0x7c0   :  { %v1154_v36 = vmul.f32 %v1543_v9, %v1147_v19 }
 0x7c2   :  { %v1161_v47 = vadd.f32 %v1544_v12, %v1154_v36 }
 0x7c4   :  { %v1163_v32 = vpack.c.bf16 %v1161_v47, %v1160_v50 }
 0x7c6   :  { %1486 = vmatmul.msk.bf16.gmra.mxu2 %vm166_vm0, %v1163_v32 }
 0x7d6   :  { %v1199_v51 = vpop.f32.mrf.mxu2 }
 0x7d7   :  { %v1200_v56 = vadd.f32 %v1545_v53, %v1199_v51 }
 0x7d9   :  { %v1209_v2 = vmax.f32 %v1200_v56, 0.0 }
 0x7de   :  { %v1201_v29 = vpop.f32.mrf.mxu2 }
 0x7df   :  { %v1202_v57 = vadd.f32 %v1545_v53, %v1201_v29  ;;  %v1547_v29 = vld [vmem:[%s2247_s16] ss:$0 sm:$0xff]  ;;  %s1769_s16 = smov [#allocation10]  }
 0x7e1   :  { %v1210_v58 = vmax.f32 %v1202_v57, 0.0 }
 0x7e3   :  { %v1213_v59 = vpack.c.bf16 %v1210_v58, %v1209_v2  ;;  %v1548_v58 = vld [vmem:[%s2248_s17] ss:$0 sm:$0xff]  ;;  %s1398_s17 = sshll.u32 %s1769_s16, 4  ;;  %s1399_s17 = int_to_ptr.vmem [resolvable:$true] %s1398_s17 }
 0x7e5   :  { %1503 = vmatmul.msk.bf16.vlgmr.msrb.gmra.mxu3 %vm1251_vm2, %v1213_v59 }
 0x849   :  { %v1204_v60 = vpop.f32.mrf.mxu2 }
 0x84a   :  { %v1205_v61 = vadd.f32 %v1545_v53, %v1204_v60 }
 0x84c   :  { %v1211_v0 = vmax.f32 %v1205_v61, 0.0 }
 0x851   :  { %v1206_v62 = vpop.f32.mrf.mxu2 }
 0x852   :  { %v1207_v63 = vadd.f32 %v1545_v53, %v1206_v62 }
 0x854   :  { %v1212_v28 = vmax.f32 %v1207_v63, 0.0 }
 0x856   :  { %v1214_v1 = vpack.c.bf16 %v1212_v28, %v1211_v0 }
 0x858   :  { %1504 = vmatmul.msk.bf16.gmra.mxu3 %vm1251_vm2, %v1214_v1 }
 0x868   :  { %v1267_v8 = vpop.f32.mrf.mxu3 }
 0x869   :  { %v1268_v4 = vadd.f32 %v1546_v3, %v1267_v8 }
 0x86b   :  { %v1277_v5 = vadd.f32 %v1268_v4, %v2157_v15 }
 0x86d   :  { %v1283_v6 = vsel %vm166_vm0, %v1277_v5, 0.0 }
 0x86e   :  { %1284 = vadd.xlane.f32.xlu1 %v1283_v6 }
 0x870   :  { %v1269_v7 = vpop.f32.mrf.mxu3 }
 0x871   :  { %v1270_v9 = vadd.f32 %v1546_v3, %v1269_v7 }
 0x873   :  { %v1278_v10 = vadd.f32 %v1270_v9, %v2159_v18 }
 0x875   :  { %v1286_v43 = vsel %vm166_vm0, %v1278_v10, 0.0 }
 0x876   :  { %1287 = vadd.xlane.f32.xlu2 %v1286_v43 }
 0x8db   :  { %v1272_v11 = vpop.f32.mrf.mxu3 }
 0x8dc   :  { %v1273_v12 = vadd.f32 %v1546_v3, %v1272_v11 }
 0x8de   :  { %v1279_v54 = vadd.f32 %v1273_v12, %v1160_v50 }
 0x8e0   :  { %v1289_v13 = vsel %vm166_vm0, %v1279_v54, 0.0 }
 0x8e1   :  { %1290 = vadd.xlane.f32.xlu0 %v1289_v13  ;;  %v1285_v14 = vpop.xlane.xlu1 %1284 }
 0x8e2   :  { %v1295_v55 = vmul.f32 %v1285_v14, %v2122_v31 }
 0x8e3   :  { %v1274_v15 = vpop.f32.mrf.mxu3 }
 0x8e4   :  { %v1299_v23 = vsub.f32 %v1277_v5, %v1295_v55  ;;  %v1275_v24 = vadd.f32 %v1546_v3, %v1274_v15 }
 0x8e6   :  { %v1280_v25 = vadd.f32 %v1275_v24, %v1161_v47  ;;  %v1303_v27 = vmul.f32 %v1299_v23, %v1299_v23 }
 0x8e8   :  { %v1292_v26 = vsel %vm166_vm0, %v1280_v25, 0.0  ;;  %v1307_v18 = vsel %vm166_vm0, %v1303_v27, 0.0 }
 0x8e9   :  { %v1288_v30 = vpop.xlane.xlu2 %1287  ;;  %1293 = vadd.xlane.f32.xlu1 %v1292_v26  ;;  %1308 = vadd.xlane.f32.xlu2 %v1307_v18 }
 0x8ea   :  { %v1296_v33 = vmul.f32 %v1288_v30, %v2122_v31 }
 0x8ec   :  { %v1300_v17 = vsub.f32 %v1278_v10, %v1296_v33 }
 0x8ee   :  { %v1304_v34 = vmul.f32 %v1300_v17, %v1300_v17 }
 0x8f0   :  { %v1310_v48 = vsel %vm166_vm0, %v1304_v34, 0.0 }
 0x8f1   :  { %1311 = vadd.xlane.f32.xlu0 %v1310_v48 }
 0x954   :  { %v1291_v35 = vpop.xlane.xlu0 %1290 }
 0x955   :  { %v1297_v37 = vmul.f32 %v1291_v35, %v2122_v31 }
 0x957   :  { %v2198_v16 = vsub.f32 %v1279_v54, %v1297_v37 }
 0x959   :  { %v1305_v38 = vmul.f32 %v2198_v16, %v2198_v16 }
 0x95b   :  { %v1313_v39 = vsel %vm166_vm0, %v1305_v38, 0.0 }
 0x95c   :  { %1314 = vadd.xlane.f32.xlu1 %v1313_v39  ;;  %v1309_v40 = vpop.xlane.xlu2 %1308  ;;  %v1294_v41 = vpop.xlane.xlu1 %1293 }
 0x95d   :  { %v1319_v52 = vmul.f32 %v1309_v40, %v2122_v31  ;;  %v1298_v42 = vmul.f32 %v1294_v41, %v2122_v31 }
 0x95f   :  { %v1323_v21 = vadd.f32 1e-05, %v1319_v52  ;;  %v2205_v20 = vsub.f32 %v1280_v25, %v1298_v42 }
 0x961   :  { %1623 = vrsqrt.f32 %v1323_v21  ;;  %v1306_v44 = vmul.f32 %v2205_v20, %v2205_v20  ;;  %vm1333_vm4 = vweird.f32 %v1323_v21 }
 0x963   :  { %v1316_v45 = vsel %vm166_vm0, %v1306_v44, 0.0 }
 0x964   :  { %v1312_v46 = vpop.xlane.xlu0 %1311  ;;  %1317 = vadd.xlane.f32.xlu2 %v1316_v45 }
 0x965   :  { %v1320_v19 = vmul.f32 %v1312_v46, %v2122_v31 }
 0x967   :  { %v1624_v22 = vpop.eup %1623  ;;  %v1324_v36 = vadd.f32 1e-05, %v1320_v19 }
 0x968   :  { %v1328_v49 = vmul.f32 %v1624_v22, %v1323_v21  ;;  %vm1334_vm3 = vweird.f32 %v1624_v22 }
 0x969   :  { %1625 = vrsqrt.f32 %v1324_v36  ;;  %vm1335_vm0 = vmor %vm1333_vm4, %vm1334_vm3  ;;  %vm1343_vm6 = vweird.f32 %v1324_v36 }
 0x96a   :  { %v1329_v50 = vmul.f32 %v1624_v22, %v1328_v49 }
 0x96c   :  { %v1330_v47 = vmul.f32 0.5, %v1329_v50 }
 0x96e   :  { %v1331_v32 = vsub.f32 1.5, %v1330_v47 }
 0x96f   :  { %v1626_v51 = vpop.eup %1625 }
 0x970   :  { %v1332_v53 = vmul.f32 %v1624_v22, %v1331_v32  ;;  %v1338_v56 = vmul.f32 %v1626_v51, %v1324_v36  ;;  %vm1344_vm5 = vweird.f32 %v1626_v51 }
 0x971   :  { %vm1345_vm8 = vmor %vm1343_vm6, %vm1344_vm5 }
 0x972   :  { %v1336_v57 = vsel %vm1335_vm0, %v1624_v22, %v1332_v53  ;;  %v1339_v2 = vmul.f32 %v1626_v51, %v1338_v56 }
 0x973   :  { %v1367_v59 = vmul.f32 %v1336_v57, %v1299_v23 }
 0x974   :  { %v1340_v60 = vmul.f32 0.5, %v1339_v2 }
 0x975   :  { %v1374_v61 = vmul.f32 %v1547_v29, %v1367_v59 }
 0x976   :  { %v1341_v62 = vsub.f32 1.5, %v1340_v60 }
 0x977   :  { %v1381_v63 = vadd.f32 %v1548_v58, %v1374_v61 }
 0x978   :  { %v1342_v0 = vmul.f32 %v1626_v51, %v1341_v62 }
 0x979   :  { %v1385_v28 = vpack.c.bf16 %v1381_v63, %v1381_v63 }
 0x97a   :  { %v1346_v1 = vsel %vm1345_vm8, %v1626_v51, %v1342_v0 }
 0x97b   :  { %v1368_v3 = vmul.f32 %v1346_v1, %v1300_v17  ;;  %1390 = vst.msk [vmem:[#allocation10] sm:$0xf] %vm1389_vm7, %v1385_v28 }
 0x97d   :  { %v1375_v8 = vmul.f32 %v1547_v29, %v1368_v3 }
 0x97f   :  { %v1382_v4 = vadd.f32 %v1548_v58, %v1375_v8 }
 0x981   :  { %v1386_v5 = vpack.c.bf16 %v1382_v4, %v1382_v4 }
 0x983   :  { %1391 = vst.msk [vmem:[#allocation10 + $0x4] sm:$0xf] %vm1389_vm7, %v1386_v5 }
 0x9cf   :  { %v1315_v6 = vpop.xlane.xlu1 %1314 }
 0x9d0   :  { %v1321_v7 = vmul.f32 %v1315_v6, %v2122_v31 }
 0x9d2   :  { %v1325_v9 = vadd.f32 1e-05, %v1321_v7 }
 0x9d4   :  { %1627 = vrsqrt.f32 %v1325_v9  ;;  %vm1353_vm10 = vweird.f32 %v1325_v9 }
 0x9d7   :  { %v1318_v10 = vpop.xlane.xlu2 %1317 }
 0x9d8   :  { %v1322_v43 = vmul.f32 %v1318_v10, %v2122_v31 }
 0x9da   :  { %v1628_v11 = vpop.eup %1627  ;;  %v1326_v12 = vadd.f32 1e-05, %v1322_v43 }
 0x9db   :  { %v1348_v54 = vmul.f32 %v1628_v11, %v1325_v9  ;;  %vm1354_vm9 = vweird.f32 %v1628_v11 }
 0x9dc   :  { %1629 = vrsqrt.f32 %v1326_v12  ;;  %vm1355_vm11 = vmor %vm1353_vm10, %vm1354_vm9  ;;  %vm1363_vm13 = vweird.f32 %v1326_v12 }
 0x9dd   :  { %v1349_v13 = vmul.f32 %v1628_v11, %v1348_v54 }
 0x9df   :  { %v1350_v14 = vmul.f32 0.5, %v1349_v13 }
 0x9e1   :  { %v1351_v55 = vsub.f32 1.5, %v1350_v14 }
 0x9e2   :  { %v1630_v15 = vpop.eup %1629 }
 0x9e3   :  { %v1352_v23 = vmul.f32 %v1628_v11, %v1351_v55  ;;  %v1358_v24 = vmul.f32 %v1630_v15, %v1326_v12  ;;  %vm1364_vm12 = vweird.f32 %v1630_v15 }
 0x9e4   :  { %vm1365_vm14 = vmor %vm1363_vm13, %vm1364_vm12 }
 0x9e5   :  { %v1356_v25 = vsel %vm1355_vm11, %v1628_v11, %v1352_v23  ;;  %v1359_v27 = vmul.f32 %v1630_v15, %v1358_v24 }
 0x9e6   :  { %v1369_v26 = vmul.f32 %v1356_v25, %v2198_v16 }
 0x9e7   :  { %v1360_v18 = vmul.f32 0.5, %v1359_v27 }
 0x9e8   :  { %v1376_v30 = vmul.f32 %v1547_v29, %v1369_v26 }
 0x9e9   :  { %v1361_v31 = vsub.f32 1.5, %v1360_v18 }
 0x9ea   :  { %v1383_v33 = vadd.f32 %v1548_v58, %v1376_v30 }
 0x9eb   :  { %v1362_v17 = vmul.f32 %v1630_v15, %v1361_v31 }
 0x9ec   :  { %v1387_v34 = vpack.c.bf16 %v1383_v33, %v1383_v33 }
 0x9ed   :  { %v1366_v48 = vsel %vm1365_vm14, %v1630_v15, %v1362_v17 }
 0x9ee   :  { %v1370_v35 = vmul.f32 %v1366_v48, %v2205_v20  ;;  %1392 = vst.msk [vmem:[#allocation10 + $0x8] sm:$0xf] %vm1389_vm7, %v1387_v34 }
 0x9f0   :  { %v1377_v37 = vmul.f32 %v1547_v29, %v1370_v35 }
 0x9f2   :  { %v1384_v16 = vadd.f32 %v1548_v58, %v1377_v37 }
 0x9f4   :  { %v1388_v38 = vpack.c.bf16 %v1384_v16, %v1384_v16 }
 0x9f6   :  { %1393 = vst.msk [vmem:[#allocation10 + $0xc] sm:$0xf] %vm1389_vm7, %v1388_v38 }
 0x9f7   :  { %1406 = dma.vmem_to_hbm [thread:$0]  %s1399_s17, 256, %s1401_s24, [#allocation4], %s1760_s21, %s1760_s21, %s1761_s22  }
 0x9f8   :  { %1757 = dma.done.wait [#allocation4], 256  }
 0x9f9   :  { %1758 = vsyncadd [#allocation4], 4294967040 }
 0x9fa   :  { %1411 = vsyncpa [#allocation3], 1 }
 0x9fb   :  { %1412 = vsyncpa [#allocation6], 1 }
 0x9fc   :  { %1413 = vsyncpa [#allocation9], 1 }
 0x9fd   :  { %1414 = vsyncpa [#allocation4], 1 }

</bundles_post_ra>
